<compile_context>
chip_gen: v5e
topology: v5e:2x2
jax: 0.10.0
libtpu: 0.0.40
codegen_flags: <defaults>
</compile_context>

<pallas_src>
import jax
import jax.numpy as jnp
from jax import lax
from jax.experimental import pallas as pl
from jax.experimental.pallas import tpu as pltpu

EPS = 1e-5
PER_LAYER = 11  # weight tensors per ResidualBlock (after the dt_proj fold)


def make_fused_kernel(n_layer, bt, seq_len):
    """Fused forward kernel for one (bt, seq_len) batch tile."""
    L = seq_len
    rows = bt * L

    def kernel(*refs):
        # refs = (x, *layer_weights, *head_weights, out)
        x_ref = refs[0]
        out_ref = refs[-1]
        w = refs[1:-1]

        d_inner = w[1].shape[1]          # in_proj output width (same for all layers)

        # Conv edge masks, (rows, 1) only — broadcast along lanes inside where().
        # Batch is folded along rows, so sequence edges are rows with row%L==0/L-1.
        pos = lax.broadcasted_iota(jnp.int32, (rows, 1), 0) % L
        first_row = pos == 0
        last_row = pos == (L - 1)

        def layer_forward(xf, wr):
            (nw, win, b_in, wc, bc, wxf, bxf, alog, dpar, wout, bout) = wr
            n = alog.shape[0]

            # RMSNorm (norm1)
            ms = jnp.mean(xf * xf, axis=-1, keepdims=True)
            xn = xf * lax.rsqrt(ms + EPS) * nw[...]

            # in_proj (bf16 MXU operands, f32 accumulate)
            h = jnp.dot(xn.astype(jnp.bfloat16), win[...],
                        preferred_element_type=jnp.float32) + b_in[...]

            # depthwise conv1d, kernel=3, padding=1 (symmetric, as in the
            # reference Conv1d).  Batch folded along rows -> mask the rows at
            # each sequence boundary.
            h_prev = jnp.where(first_row, 0.0, pltpu.roll(h, shift=1, axis=0))
            h_next = jnp.where(last_row, 0.0,
                               pltpu.roll(h, shift=rows - 1, axis=0))
            wck = wc[...]
            hc = h_prev * wck[0:1] + h * wck[1:2] + h_next * wck[2:3] + bc[...]

            # SiLU (dropout = identity in eval mode)
            u = hc * jax.nn.sigmoid(hc)

            # fused x_proj ∘ dt_proj: one matmul emits [dz(d_inner) | B(n)]
            xdbl = jnp.dot(u.astype(jnp.bfloat16), wxf[...],
                           preferred_element_type=jnp.float32) + bxf[...]
            dz = xdbl[:, :d_inner]
            Bm = xdbl[:, d_inner:]

            # softplus with PyTorch's threshold-20 behaviour
            delta = jnp.where(dz > 20.0, dz,
                              jnp.log1p(jnp.exp(jnp.minimum(dz, 20.0))))

            # ---- selective scan ----
            # Precompute dA / dBu for all L steps in one batched pass (EUP at
            # throughput, off the serial chain).  Time index is above the
            # minor-two dims, so dA[:, i] / dBu[:, i] are free vreg selects.
            A = -jnp.exp(alog[...])                            # (n, d_inner)
            d4 = delta.reshape(bt, L, 1, d_inner)
            du4 = (delta * u).reshape(bt, L, 1, d_inner)
            B4 = Bm.reshape(bt, L, n, 1)
            dA = jnp.exp(d4 * A.reshape(1, 1, n, d_inner))     # (bt, L, n, d_inner)
            dBu = du4 * B4                                     # (bt, L, n, d_inner)
            # TODO(synk): for large bt*L*n*d_inner, chunk dA/dBu against the
            # 64 MiB v7x VMEM budget (or switch to a log-depth associative scan).

            state = jnp.zeros((bt, n, d_inner), jnp.float32)
            ys = []
            # L small & static -> fully unrolled; the per-step sum over n is a
            # side output (off the recurrence critical path).
            for i in range(L):
                state = dA[:, i] * state + dBu[:, i]
                ys.append(jnp.sum(state, axis=1, keepdims=True))   # (bt, 1, d_inner)
            y = jnp.concatenate(ys, axis=1).reshape(rows, d_inner)
            y = y + u * dpar[...]

            # out_proj (dropouts = identity).  Note: ResidualBlock has no
            # residual add in the reference — the output replaces x.
            return jnp.dot(y.astype(jnp.bfloat16), wout[...],
                           preferred_element_type=jnp.float32) + bout[...]

        xf = x_ref[...]                                        # (bt*L, d_model) f32
        for li in range(n_layer):
            xf = layer_forward(xf, w[li * PER_LAYER:(li + 1) * PER_LAYER])
        # TODO(synk): for deep models, stream layer weights with an inner
        # "arbitrary" grid axis / emit_pipeline instead of keeping all resident.

        # head: norm_f -> (dropout = identity) -> mean over sequence -> output_proj
        nfw, wp, bp = w[n_layer * PER_LAYER:]
        d_model = xf.shape[-1]
        ms = jnp.mean(xf * xf, axis=-1, keepdims=True)
        xn = xf * lax.rsqrt(ms + EPS) * nfw[...]
        xm = jnp.mean(xn.reshape(bt, L, d_model), axis=1)      # (bt, d_model)
        out_ref[...] = jnp.dot(xm.astype(jnp.bfloat16), wp[...],
                               preferred_element_type=jnp.float32) + bp[...]

    return kernel


def sequence_embedding_forward(params, input_ids, batch_tile=None,
                               vmem_limit_bytes=None):
    b, l = input_ids.shape
    d_model = params["embedding"].shape[1]
    d_inner = params["layers"][0]["win_t"].shape[1]
    n = params["layers"][0]["alog_t"].shape[0]
    out_dim = params["wp_t"].shape[1]
    n_layer = len(params["layers"])

    # Embedding gather kept as plain-JAX glue (data-dependent lookup).
    x = jnp.take(params["embedding"], input_ids, axis=0)      # (b, l, d_model)
    xf = x.reshape(b * l, d_model)                             # fold batch into rows

    # On v7x (2 TCs/chip) pass batch_tile=b//2 when both bt and bt*l stay
    # multiples of 8 (or equal to the full dims); default keeps one tile.
    bt = b if batch_tile is None else batch_tile
    assert b % bt == 0, "batch must be divisible by the batch tile"
    grid = (b // bt,)

    weights = []
    for p in params["layers"]:
        weights += [p["norm_w"], p["win_t"], p["b_in"], p["w_conv"], p["b_conv"],
                    p["wxf_t"], p["b_xf"], p["alog_t"], p["d_par"],
                    p["wout_t"], p["b_out"]]
    weights += [params["norm_f_w"], params["wp_t"], params["b_p"]]
    weights = tuple(weights)

    # Grid-invariant weights: whole-array, single resident VMEM copy (no
    # double-buffered pipelining).
    w_specs = [pl.BlockSpec(memory_space=pltpu.MemorySpace.VMEM) for _ in weights]

    # Explicit VMEM budget: weights + activation working set + scan temps,
    # 2x headroom, clamped to stay legal on v7x's 64 MiB per-TC VMEM.
    if vmem_limit_bytes is None:
        rows = bt * l
        wbytes = sum(int(a.size) * a.dtype.itemsize for a in weights)
        act = rows * (d_model + 4 * d_inner + (d_inner + n)) * 4
        scan = 3 * bt * l * n * d_inner * 4                    # dA, dBu, states
        io = 2 * rows * d_model * 4 + 2 * bt * out_dim * 4     # pipelined in/out
        vmem_limit_bytes = 2 * (wbytes + act + scan + io) + (4 << 20)
        vmem_limit_bytes = int(min(max(vmem_limit_bytes, 16 << 20), 48 << 20))

    kernel = make_fused_kernel(n_layer, bt, l)

    grid_spec = pltpu.PrefetchScalarGridSpec(
        num_scalar_prefetch=0,
        grid=grid,
        in_specs=[pl.BlockSpec((bt * l, d_model), lambda i: (i, 0))] + w_specs,
        out_specs=pl.BlockSpec((bt, out_dim), lambda i: (i, 0)),
        scratch_shapes=[],
    )
    return pl.pallas_call(
        kernel,
        out_shape=jax.ShapeDtypeStruct((b, out_dim), jnp.float32),
        grid_spec=grid_spec,
        compiler_params=pltpu.CompilerParams(
            # batch tiles are independent -> parallel (uses both TCs on v7x)
            dimension_semantics=("parallel",),
            vmem_limit_bytes=vmem_limit_bytes),
    )(xf, *weights)


def init_params(key, d_model, d_inner, n_ssm, dt_rank, vocab_size, n_layer, output_dim):
    n = n_ssm // 2
    keys = iter(jax.random.split(key, 8 + n_layer * 16))
    nk = lambda: next(keys)

    def lin(kin, kout):
        # PyTorch Linear layout: W (out, in), b (out,)
        w = 0.1 * jax.random.normal(nk(), (kout, kin), jnp.float32)
        bb = 0.1 * jax.random.normal(nk(), (1, kout), jnp.float32)
        return w, bb

    params = {"embedding": jax.random.normal(nk(), (vocab_size, d_model), jnp.float32)}
    layers = []
    for _ in range(n_layer):
        p = {}
        p["norm_w"] = jnp.ones((1, d_model), jnp.float32)

        w_in, p["b_in"] = lin(d_model, d_inner)
        p["win_t"] = w_in.T.astype(jnp.bfloat16)               # (d_model, d_inner)

        p["w_conv"] = 0.3 * jax.random.normal(nk(), (3, d_inner), jnp.float32)  # (taps, ch)
        p["b_conv"] = 0.1 * jax.random.normal(nk(), (1, d_inner), jnp.float32)

        # x_proj (d_inner -> dt_rank + n, output order [delta | B]) and
        # dt_proj (dt_rank -> d_inner), precomposed in f32:
        #   dz = u @ (W_dt @ W_x_delta)^T + (b_x_delta @ W_dt^T + b_dt)
        w_x, b_x = lin(d_inner, dt_rank + n)
        w_dt, b_dt = lin(dt_rank, d_inner)
        w_x_delta, w_x_B = w_x[:dt_rank], w_x[dt_rank:]
        b_x_delta, b_x_B = b_x[:, :dt_rank], b_x[:, dt_rank:]
        w_dz = (w_dt @ w_x_delta).T                            # (d_inner, d_inner)
        b_dz = b_x_delta @ w_dt.T + b_dt                       # (1, d_inner)
        p["wxf_t"] = jnp.concatenate([w_dz, w_x_B.T], axis=1).astype(jnp.bfloat16)
        p["b_xf"] = jnp.concatenate([b_dz, b_x_B], axis=1)     # (1, d_inner + n) f32

        a_log = jax.random.normal(nk(), (d_inner, n), jnp.float32)   # PyTorch (d_inner, n)
        p["alog_t"] = a_log.T                                  # (n, d_inner)
        p["d_par"] = jax.random.normal(nk(), (1, d_inner), jnp.float32)

        w_out, p["b_out"] = lin(d_inner, d_model)
        p["wout_t"] = w_out.T.astype(jnp.bfloat16)             # (d_inner, d_model)
        layers.append(p)
    params["layers"] = layers
    params["norm_f_w"] = jnp.ones((1, d_model), jnp.float32)
    w_p, params["b_p"] = lin(d_model, output_dim)
    params["wp_t"] = w_p.T.astype(jnp.bfloat16)                # (d_model, output_dim)
    return params


if __name__ == "__main__":
    d_model, d_inner, n_ssm, dt_rank = 32, 64, 16, 4
    vocab_size, n_layer, output_dim = 50, 2, 128
    b, l = 2, 8   # l a multiple of 8 so (b*l, D) <-> (b, l, D) reshapes are tile-aligned

    key = jax.random.PRNGKey(0)
    pkey, ikey = jax.random.split(key)
    params = init_params(pkey, d_model, d_inner, n_ssm, dt_rank,
                         vocab_size, n_layer, output_dim)
    input_ids = jax.random.randint(ikey, (b, l), 0, vocab_size, dtype=jnp.int32)

    out = sequence_embedding_forward(params, input_ids)
    jax.block_until_ready(out)
    assert out.shape == (b, output_dim) and out.dtype == jnp.float32
    print("KERNEL_OK")
</pallas_src>

<mosaic_0001>
module attributes {stable_mosaic.version = 11 : i64} {
  func.func @kernel(%arg0: i32, %arg1: memref<16x32xf32, #tpu.memory_space<vmem>>, %arg2: memref<1x32xf32, #tpu.memory_space<vmem>>, %arg3: memref<32x64xbf16, #tpu.memory_space<vmem>>, %arg4: memref<1x64xf32, #tpu.memory_space<vmem>>, %arg5: memref<3x64xf32, #tpu.memory_space<vmem>>, %arg6: memref<1x64xf32, #tpu.memory_space<vmem>>, %arg7: memref<64x72xbf16, #tpu.memory_space<vmem>>, %arg8: memref<1x72xf32, #tpu.memory_space<vmem>>, %arg9: memref<8x64xf32, #tpu.memory_space<vmem>>, %arg10: memref<1x64xf32, #tpu.memory_space<vmem>>, %arg11: memref<64x32xbf16, #tpu.memory_space<vmem>>, %arg12: memref<1x32xf32, #tpu.memory_space<vmem>>, %arg13: memref<1x32xf32, #tpu.memory_space<vmem>>, %arg14: memref<32x64xbf16, #tpu.memory_space<vmem>>, %arg15: memref<1x64xf32, #tpu.memory_space<vmem>>, %arg16: memref<3x64xf32, #tpu.memory_space<vmem>>, %arg17: memref<1x64xf32, #tpu.memory_space<vmem>>, %arg18: memref<64x72xbf16, #tpu.memory_space<vmem>>, %arg19: memref<1x72xf32, #tpu.memory_space<vmem>>, %arg20: memref<8x64xf32, #tpu.memory_space<vmem>>, %arg21: memref<1x64xf32, #tpu.memory_space<vmem>>, %arg22: memref<64x32xbf16, #tpu.memory_space<vmem>>, %arg23: memref<1x32xf32, #tpu.memory_space<vmem>>, %arg24: memref<1x32xf32, #tpu.memory_space<vmem>>, %arg25: memref<32x128xbf16, #tpu.memory_space<vmem>>, %arg26: memref<1x128xf32, #tpu.memory_space<vmem>>, %arg27: memref<2x128xf32, #tpu.memory_space<vmem>>) attributes {dimension_semantics = [#tpu.dimension_semantics<parallel>], iteration_bounds = array<i64: 1>, scalar_prefetch = 0 : i64, scratch_operands = 0 : i64, tpu.core_type = #tpu.core_type<tc>, window_params = [{transform_indices = @transform_0, window_bounds = array<i64: 16, 32>}, {pipeline_mode = #tpu.pipeline_mode<synchronous>, transform_indices = @transform_1, window_bounds = array<i64: 1, 32>}, {pipeline_mode = #tpu.pipeline_mode<synchronous>, transform_indices = @transform_2, window_bounds = array<i64: 32, 64>}, {pipeline_mode = #tpu.pipeline_mode<synchronous>, transform_indices = @transform_3, window_bounds = array<i64: 1, 64>}, {pipeline_mode = #tpu.pipeline_mode<synchronous>, transform_indices = @transform_4, window_bounds = array<i64: 3, 64>}, {pipeline_mode = #tpu.pipeline_mode<synchronous>, transform_indices = @transform_5, window_bounds = array<i64: 1, 64>}, {pipeline_mode = #tpu.pipeline_mode<synchronous>, transform_indices = @transform_6, window_bounds = array<i64: 64, 72>}, {pipeline_mode = #tpu.pipeline_mode<synchronous>, transform_indices = @transform_7, window_bounds = array<i64: 1, 72>}, {pipeline_mode = #tpu.pipeline_mode<synchronous>, transform_indices = @transform_8, window_bounds = array<i64: 8, 64>}, {pipeline_mode = #tpu.pipeline_mode<synchronous>, transform_indices = @transform_9, window_bounds = array<i64: 1, 64>}, {pipeline_mode = #tpu.pipeline_mode<synchronous>, transform_indices = @transform_10, window_bounds = array<i64: 64, 32>}, {pipeline_mode = #tpu.pipeline_mode<synchronous>, transform_indices = @transform_11, window_bounds = array<i64: 1, 32>}, {pipeline_mode = #tpu.pipeline_mode<synchronous>, transform_indices = @transform_12, window_bounds = array<i64: 1, 32>}, {pipeline_mode = #tpu.pipeline_mode<synchronous>, transform_indices = @transform_13, window_bounds = array<i64: 32, 64>}, {pipeline_mode = #tpu.pipeline_mode<synchronous>, transform_indices = @transform_14, window_bounds = array<i64: 1, 64>}, {pipeline_mode = #tpu.pipeline_mode<synchronous>, transform_indices = @transform_15, window_bounds = array<i64: 3, 64>}, {pipeline_mode = #tpu.pipeline_mode<synchronous>, transform_indices = @transform_16, window_bounds = array<i64: 1, 64>}, {pipeline_mode = #tpu.pipeline_mode<synchronous>, transform_indices = @transform_17, window_bounds = array<i64: 64, 72>}, {pipeline_mode = #tpu.pipeline_mode<synchronous>, transform_indices = @transform_18, window_bounds = array<i64: 1, 72>}, {pipeline_mode = #tpu.pipeline_mode<synchronous>, transform_indices = @transform_19, window_bounds = array<i64: 8, 64>}, {pipeline_mode = #tpu.pipeline_mode<synchronous>, transform_indices = @transform_20, window_bounds = array<i64: 1, 64>}, {pipeline_mode = #tpu.pipeline_mode<synchronous>, transform_indices = @transform_21, window_bounds = array<i64: 64, 32>}, {pipeline_mode = #tpu.pipeline_mode<synchronous>, transform_indices = @transform_22, window_bounds = array<i64: 1, 32>}, {pipeline_mode = #tpu.pipeline_mode<synchronous>, transform_indices = @transform_23, window_bounds = array<i64: 1, 32>}, {pipeline_mode = #tpu.pipeline_mode<synchronous>, transform_indices = @transform_24, window_bounds = array<i64: 32, 128>}, {pipeline_mode = #tpu.pipeline_mode<synchronous>, transform_indices = @transform_25, window_bounds = array<i64: 1, 128>}, {transform_indices = @transform_26, window_bounds = array<i64: 2, 128>}]} {
    %0 = tpu.iota {dimensions = array<i32: 0>} : vector<16x1xi32>
    %c8_i32 = arith.constant 8 : i32
    %c0_i32 = arith.constant 0 : i32
    %1 = arith.cmpi eq, %c8_i32, %c0_i32 : i32
    %c1_i32 = arith.constant 1 : i32
    %2 = arith.select %1, %c1_i32, %c8_i32 : i32
    %3 = vector.broadcast %2 : i32 to vector<16x1xi32>
    %4 = arith.remsi %0, %3 : vector<16x1xi32>
    %c0_i32_0 = arith.constant 0 : i32
    %5 = vector.broadcast %c0_i32_0 : i32 to vector<16x1xi32>
    %6 = arith.cmpi ne, %4, %5 : vector<16x1xi32>
    %c0_i32_1 = arith.constant 0 : i32
    %7 = vector.broadcast %c0_i32_1 : i32 to vector<16x1xi32>
    %8 = arith.cmpi slt, %4, %7 : vector<16x1xi32>
    %c0_i32_2 = arith.constant 0 : i32
    %9 = arith.cmpi slt, %2, %c0_i32_2 : i32
    %10 = vector.broadcast %9 : i1 to vector<16x1xi1>
    %11 = vector.broadcast %10 : vector<16x1xi1> to vector<16x1xi1>
    %12 = arith.xori %8, %11 : vector<16x1xi1>
    %13 = arith.andi %12, %6 : vector<16x1xi1>
    %14 = vector.broadcast %2 : i32 to vector<16x1xi32>
    %15 = arith.addi %4, %14 : vector<16x1xi32>
    %16 = arith.select %13, %15, %4 : vector<16x1xi1>, vector<16x1xi32>
    %c0_i32_3 = arith.constant 0 : i32
    %17 = vector.broadcast %c0_i32_3 : i32 to vector<16x1xi32>
    %18 = arith.cmpi eq, %16, %17 : vector<16x1xi32>
    %c7_i32 = arith.constant 7 : i32
    %19 = vector.broadcast %c7_i32 : i32 to vector<16x1xi32>
    %20 = arith.cmpi eq, %16, %19 : vector<16x1xi32>
    %c0 = arith.constant 0 : index
    %c0_4 = arith.constant 0 : index
    %21 = vector.load %arg1[%c0, %c0_4] : memref<16x32xf32, #tpu.memory_space<vmem>>, vector<16x32xf32>
    %22 = arith.mulf %21, %21 : vector<16x32xf32>
    %cst = arith.constant dense<0.000000e+00> : vector<16xf32>
    %23 = vector.multi_reduction <add>, %22, %cst [1] : vector<16x32xf32> to vector<16xf32>
    %24 = vector.shape_cast %23 : vector<16xf32> to vector<16x1xf32>
    %cst_5 = arith.constant 3.200000e+01 : f32
    %25 = vector.broadcast %cst_5 : f32 to vector<16x1xf32>
    %26 = arith.divf %24, %25 : vector<16x1xf32>
    %cst_6 = arith.constant 9.99999974E-6 : f32
    %27 = vector.broadcast %cst_6 : f32 to vector<16x1xf32>
    %28 = arith.addf %26, %27 : vector<16x1xf32>
    %29 = math.rsqrt %28 : vector<16x1xf32>
    %30 = vector.broadcast %29 : vector<16x1xf32> to vector<16x32xf32>
    %31 = arith.mulf %21, %30 : vector<16x32xf32>
    %c0_7 = arith.constant 0 : index
    %c0_8 = arith.constant 0 : index
    %32 = vector.load %arg2[%c0_7, %c0_8] : memref<1x32xf32, #tpu.memory_space<vmem>>, vector<1x32xf32>
    %33 = vector.broadcast %32 : vector<1x32xf32> to vector<16x32xf32>
    %34 = arith.mulf %31, %33 : vector<16x32xf32>
    %35 = arith.truncf %34 : vector<16x32xf32> to vector<16x32xbf16>
    %c0_9 = arith.constant 0 : index
    %c0_10 = arith.constant 0 : index
    %36 = vector.load %arg3[%c0_9, %c0_10] : memref<32x64xbf16, #tpu.memory_space<vmem>>, vector<32x64xbf16>
    %cst_11 = arith.constant dense<0.000000e+00> : vector<16x64xf32>
    %37 = tpu.matmul %35, %36, %cst_11 {dimension_numbers = #tpu.dot_dimension_numbers<[1], [0], [0], [1], [0, 0, 1, 1], [], []>} : vector<16x32xbf16>, vector<32x64xbf16>, vector<16x64xf32> -> vector<16x64xf32>
    %c0_12 = arith.constant 0 : index
    %c0_13 = arith.constant 0 : index
    %38 = vector.load %arg4[%c0_12, %c0_13] : memref<1x64xf32, #tpu.memory_space<vmem>>, vector<1x64xf32>
    %39 = vector.broadcast %38 : vector<1x64xf32> to vector<16x64xf32>
    %40 = arith.addf %37, %39 : vector<16x64xf32>
    %c1_i32_14 = arith.constant 1 : i32
    %41 = tpu.dynamic_rotate %40 by %c1_i32_14 dim 0 : vector<16x64xf32>, i32 -> vector<16x64xf32>
    %cst_15 = arith.constant 0.000000e+00 : f32
    %42 = vector.shape_cast %18 : vector<16x1xi1> to vector<16x1xi1>
    %43 = vector.broadcast %42 : vector<16x1xi1> to vector<16x64xi1>
    %44 = vector.broadcast %cst_15 : f32 to vector<16x64xf32>
    %45 = arith.select %43, %44, %41 : vector<16x64xi1>, vector<16x64xf32>
    %c15_i32 = arith.constant 15 : i32
    %46 = tpu.dynamic_rotate %40 by %c15_i32 dim 0 : vector<16x64xf32>, i32 -> vector<16x64xf32>
    %cst_16 = arith.constant 0.000000e+00 : f32
    %47 = vector.shape_cast %20 : vector<16x1xi1> to vector<16x1xi1>
    %48 = vector.broadcast %47 : vector<16x1xi1> to vector<16x64xi1>
    %49 = vector.broadcast %cst_16 : f32 to vector<16x64xf32>
    %50 = arith.select %48, %49, %46 : vector<16x64xi1>, vector<16x64xf32>
    %c0_17 = arith.constant 0 : index
    %c0_18 = arith.constant 0 : index
    %51 = vector.load %arg5[%c0_17, %c0_18] : memref<3x64xf32, #tpu.memory_space<vmem>>, vector<3x64xf32>
    %52 = vector.extract_strided_slice %51 {offsets = [0, 0], sizes = [1, 64], strides = [1, 1]} : vector<3x64xf32> to vector<1x64xf32>
    %53 = vector.broadcast %52 : vector<1x64xf32> to vector<16x64xf32>
    %54 = arith.mulf %45, %53 : vector<16x64xf32>
    %55 = vector.extract_strided_slice %51 {offsets = [1, 0], sizes = [1, 64], strides = [1, 1]} : vector<3x64xf32> to vector<1x64xf32>
    %56 = vector.broadcast %55 : vector<1x64xf32> to vector<16x64xf32>
    %57 = arith.mulf %40, %56 : vector<16x64xf32>
    %58 = arith.addf %54, %57 : vector<16x64xf32>
    %59 = vector.extract_strided_slice %51 {offsets = [2, 0], sizes = [1, 64], strides = [1, 1]} : vector<3x64xf32> to vector<1x64xf32>
    %60 = vector.broadcast %59 : vector<1x64xf32> to vector<16x64xf32>
    %61 = arith.mulf %50, %60 : vector<16x64xf32>
    %62 = arith.addf %58, %61 : vector<16x64xf32>
    %c0_19 = arith.constant 0 : index
    %c0_20 = arith.constant 0 : index
    %63 = vector.load %arg6[%c0_19, %c0_20] : memref<1x64xf32, #tpu.memory_space<vmem>>, vector<1x64xf32>
    %64 = vector.broadcast %63 : vector<1x64xf32> to vector<16x64xf32>
    %65 = arith.addf %62, %64 : vector<16x64xf32>
    %66 = arith.negf %65 : vector<16x64xf32>
    %67 = math.exp %66 : vector<16x64xf32>
    %cst_21 = arith.constant 1.000000e+00 : f32
    %68 = vector.broadcast %cst_21 : f32 to vector<16x64xf32>
    %69 = arith.addf %68, %67 : vector<16x64xf32>
    %70 = arith.divf %68, %69 : vector<16x64xf32>
    %71 = arith.mulf %65, %70 : vector<16x64xf32>
    %72 = arith.truncf %71 : vector<16x64xf32> to vector<16x64xbf16>
    %c0_22 = arith.constant 0 : index
    %c0_23 = arith.constant 0 : index
    %73 = vector.load %arg7[%c0_22, %c0_23] : memref<64x72xbf16, #tpu.memory_space<vmem>>, vector<64x72xbf16>
    %cst_24 = arith.constant dense<0.000000e+00> : vector<16x72xf32>
    %74 = tpu.matmul %72, %73, %cst_24 {dimension_numbers = #tpu.dot_dimension_numbers<[1], [0], [0], [1], [0, 0, 1, 1], [], []>} : vector<16x64xbf16>, vector<64x72xbf16>, vector<16x72xf32> -> vector<16x72xf32>
    %c0_25 = arith.constant 0 : index
    %c0_26 = arith.constant 0 : index
    %75 = vector.load %arg8[%c0_25, %c0_26] : memref<1x72xf32, #tpu.memory_space<vmem>>, vector<1x72xf32>
    %76 = vector.broadcast %75 : vector<1x72xf32> to vector<16x72xf32>
    %77 = arith.addf %74, %76 : vector<16x72xf32>
    %78 = vector.extract_strided_slice %77 {offsets = [0, 0], sizes = [16, 64], strides = [1, 1]} : vector<16x72xf32> to vector<16x64xf32>
    %79 = vector.extract_strided_slice %77 {offsets = [0, 64], sizes = [16, 8], strides = [1, 1]} : vector<16x72xf32> to vector<16x8xf32>
    %cst_27 = arith.constant 2.000000e+01 : f32
    %80 = vector.broadcast %cst_27 : f32 to vector<16x64xf32>
    %81 = arith.cmpf ogt, %78, %80 : vector<16x64xf32>
    %cst_28 = arith.constant 2.000000e+01 : f32
    %82 = vector.broadcast %cst_28 : f32 to vector<16x64xf32>
    %83 = arith.minimumf %78, %82 : vector<16x64xf32>
    %84 = math.exp %83 : vector<16x64xf32>
    %85 = math.log1p %84 : vector<16x64xf32>
    %86 = arith.select %81, %78, %85 : vector<16x64xi1>, vector<16x64xf32>
    %c0_29 = arith.constant 0 : index
    %c0_30 = arith.constant 0 : index
    %87 = vector.load %arg9[%c0_29, %c0_30] : memref<8x64xf32, #tpu.memory_space<vmem>>, vector<8x64xf32>
    %88 = math.exp %87 : vector<8x64xf32>
    %cst_31 = arith.constant 0.000000e+00 : f32
    %89 = vector.broadcast %cst_31 : f32 to vector<8x64xf32>
    %90 = arith.subf %89, %88 : vector<8x64xf32>
    %91 = vector.shape_cast %86 : vector<16x64xf32> to vector<2x8x1x64xf32>
    %92 = arith.mulf %86, %71 : vector<16x64xf32>
    %93 = vector.shape_cast %92 : vector<16x64xf32> to vector<2x8x1x64xf32>
    %94 = vector.shape_cast %79 : vector<16x8xf32> to vector<2x8x8x1xf32>
    %95 = vector.shape_cast %90 : vector<8x64xf32> to vector<1x1x8x64xf32>
    %96 = vector.broadcast %91 : vector<2x8x1x64xf32> to vector<2x8x8x64xf32>
    %97 = vector.broadcast %95 : vector<1x1x8x64xf32> to vector<2x8x8x64xf32>
    %98 = arith.mulf %96, %97 : vector<2x8x8x64xf32>
    %99 = math.exp %98 : vector<2x8x8x64xf32>
    %100 = vector.broadcast %93 : vector<2x8x1x64xf32> to vector<2x8x8x64xf32>
    %101 = vector.broadcast %94 : vector<2x8x8x1xf32> to vector<2x8x8x64xf32>
    %102 = arith.mulf %100, %101 : vector<2x8x8x64xf32>
    %cst_32 = arith.constant 0.000000e+00 : f32
    %103 = vector.broadcast %cst_32 : f32 to vector<2x8x64xf32>
    %104 = vector.extract_strided_slice %99 {offsets = [0, 0, 0, 0], sizes = [2, 1, 8, 64], strides = [1, 1, 1, 1]} : vector<2x8x8x64xf32> to vector<2x1x8x64xf32>
    %105 = vector.shape_cast %104 : vector<2x1x8x64xf32> to vector<2x8x64xf32>
    %106 = arith.mulf %105, %103 : vector<2x8x64xf32>
    %107 = vector.extract_strided_slice %102 {offsets = [0, 0, 0, 0], sizes = [2, 1, 8, 64], strides = [1, 1, 1, 1]} : vector<2x8x8x64xf32> to vector<2x1x8x64xf32>
    %108 = vector.shape_cast %107 : vector<2x1x8x64xf32> to vector<2x8x64xf32>
    %109 = arith.addf %106, %108 : vector<2x8x64xf32>
    %cst_33 = arith.constant dense<0.000000e+00> : vector<2x64xf32>
    %110 = vector.multi_reduction <add>, %109, %cst_33 [1] : vector<2x8x64xf32> to vector<2x64xf32>
    %111 = vector.shape_cast %110 : vector<2x64xf32> to vector<2x1x64xf32>
    %112 = vector.extract_strided_slice %99 {offsets = [0, 1, 0, 0], sizes = [2, 1, 8, 64], strides = [1, 1, 1, 1]} : vector<2x8x8x64xf32> to vector<2x1x8x64xf32>
    %113 = vector.shape_cast %112 : vector<2x1x8x64xf32> to vector<2x8x64xf32>
    %114 = arith.mulf %113, %109 : vector<2x8x64xf32>
    %115 = vector.extract_strided_slice %102 {offsets = [0, 1, 0, 0], sizes = [2, 1, 8, 64], strides = [1, 1, 1, 1]} : vector<2x8x8x64xf32> to vector<2x1x8x64xf32>
    %116 = vector.shape_cast %115 : vector<2x1x8x64xf32> to vector<2x8x64xf32>
    %117 = arith.addf %114, %116 : vector<2x8x64xf32>
    %cst_34 = arith.constant dense<0.000000e+00> : vector<2x64xf32>
    %118 = vector.multi_reduction <add>, %117, %cst_34 [1] : vector<2x8x64xf32> to vector<2x64xf32>
    %119 = vector.shape_cast %118 : vector<2x64xf32> to vector<2x1x64xf32>
    %120 = vector.extract_strided_slice %99 {offsets = [0, 2, 0, 0], sizes = [2, 1, 8, 64], strides = [1, 1, 1, 1]} : vector<2x8x8x64xf32> to vector<2x1x8x64xf32>
    %121 = vector.shape_cast %120 : vector<2x1x8x64xf32> to vector<2x8x64xf32>
    %122 = arith.mulf %121, %117 : vector<2x8x64xf32>
    %123 = vector.extract_strided_slice %102 {offsets = [0, 2, 0, 0], sizes = [2, 1, 8, 64], strides = [1, 1, 1, 1]} : vector<2x8x8x64xf32> to vector<2x1x8x64xf32>
    %124 = vector.shape_cast %123 : vector<2x1x8x64xf32> to vector<2x8x64xf32>
    %125 = arith.addf %122, %124 : vector<2x8x64xf32>
    %cst_35 = arith.constant dense<0.000000e+00> : vector<2x64xf32>
    %126 = vector.multi_reduction <add>, %125, %cst_35 [1] : vector<2x8x64xf32> to vector<2x64xf32>
    %127 = vector.shape_cast %126 : vector<2x64xf32> to vector<2x1x64xf32>
    %128 = vector.extract_strided_slice %99 {offsets = [0, 3, 0, 0], sizes = [2, 1, 8, 64], strides = [1, 1, 1, 1]} : vector<2x8x8x64xf32> to vector<2x1x8x64xf32>
    %129 = vector.shape_cast %128 : vector<2x1x8x64xf32> to vector<2x8x64xf32>
    %130 = arith.mulf %129, %125 : vector<2x8x64xf32>
    %131 = vector.extract_strided_slice %102 {offsets = [0, 3, 0, 0], sizes = [2, 1, 8, 64], strides = [1, 1, 1, 1]} : vector<2x8x8x64xf32> to vector<2x1x8x64xf32>
    %132 = vector.shape_cast %131 : vector<2x1x8x64xf32> to vector<2x8x64xf32>
    %133 = arith.addf %130, %132 : vector<2x8x64xf32>
    %cst_36 = arith.constant dense<0.000000e+00> : vector<2x64xf32>
    %134 = vector.multi_reduction <add>, %133, %cst_36 [1] : vector<2x8x64xf32> to vector<2x64xf32>
    %135 = vector.shape_cast %134 : vector<2x64xf32> to vector<2x1x64xf32>
    %136 = vector.extract_strided_slice %99 {offsets = [0, 4, 0, 0], sizes = [2, 1, 8, 64], strides = [1, 1, 1, 1]} : vector<2x8x8x64xf32> to vector<2x1x8x64xf32>
    %137 = vector.shape_cast %136 : vector<2x1x8x64xf32> to vector<2x8x64xf32>
    %138 = arith.mulf %137, %133 : vector<2x8x64xf32>
    %139 = vector.extract_strided_slice %102 {offsets = [0, 4, 0, 0], sizes = [2, 1, 8, 64], strides = [1, 1, 1, 1]} : vector<2x8x8x64xf32> to vector<2x1x8x64xf32>
    %140 = vector.shape_cast %139 : vector<2x1x8x64xf32> to vector<2x8x64xf32>
    %141 = arith.addf %138, %140 : vector<2x8x64xf32>
    %cst_37 = arith.constant dense<0.000000e+00> : vector<2x64xf32>
    %142 = vector.multi_reduction <add>, %141, %cst_37 [1] : vector<2x8x64xf32> to vector<2x64xf32>
    %143 = vector.shape_cast %142 : vector<2x64xf32> to vector<2x1x64xf32>
    %144 = vector.extract_strided_slice %99 {offsets = [0, 5, 0, 0], sizes = [2, 1, 8, 64], strides = [1, 1, 1, 1]} : vector<2x8x8x64xf32> to vector<2x1x8x64xf32>
    %145 = vector.shape_cast %144 : vector<2x1x8x64xf32> to vector<2x8x64xf32>
    %146 = arith.mulf %145, %141 : vector<2x8x64xf32>
    %147 = vector.extract_strided_slice %102 {offsets = [0, 5, 0, 0], sizes = [2, 1, 8, 64], strides = [1, 1, 1, 1]} : vector<2x8x8x64xf32> to vector<2x1x8x64xf32>
    %148 = vector.shape_cast %147 : vector<2x1x8x64xf32> to vector<2x8x64xf32>
    %149 = arith.addf %146, %148 : vector<2x8x64xf32>
    %cst_38 = arith.constant dense<0.000000e+00> : vector<2x64xf32>
    %150 = vector.multi_reduction <add>, %149, %cst_38 [1] : vector<2x8x64xf32> to vector<2x64xf32>
    %151 = vector.shape_cast %150 : vector<2x64xf32> to vector<2x1x64xf32>
    %152 = vector.extract_strided_slice %99 {offsets = [0, 6, 0, 0], sizes = [2, 1, 8, 64], strides = [1, 1, 1, 1]} : vector<2x8x8x64xf32> to vector<2x1x8x64xf32>
    %153 = vector.shape_cast %152 : vector<2x1x8x64xf32> to vector<2x8x64xf32>
    %154 = arith.mulf %153, %149 : vector<2x8x64xf32>
    %155 = vector.extract_strided_slice %102 {offsets = [0, 6, 0, 0], sizes = [2, 1, 8, 64], strides = [1, 1, 1, 1]} : vector<2x8x8x64xf32> to vector<2x1x8x64xf32>
    %156 = vector.shape_cast %155 : vector<2x1x8x64xf32> to vector<2x8x64xf32>
    %157 = arith.addf %154, %156 : vector<2x8x64xf32>
    %cst_39 = arith.constant dense<0.000000e+00> : vector<2x64xf32>
    %158 = vector.multi_reduction <add>, %157, %cst_39 [1] : vector<2x8x64xf32> to vector<2x64xf32>
    %159 = vector.shape_cast %158 : vector<2x64xf32> to vector<2x1x64xf32>
    %160 = vector.extract_strided_slice %99 {offsets = [0, 7, 0, 0], sizes = [2, 1, 8, 64], strides = [1, 1, 1, 1]} : vector<2x8x8x64xf32> to vector<2x1x8x64xf32>
    %161 = vector.shape_cast %160 : vector<2x1x8x64xf32> to vector<2x8x64xf32>
    %162 = arith.mulf %161, %157 : vector<2x8x64xf32>
    %163 = vector.extract_strided_slice %102 {offsets = [0, 7, 0, 0], sizes = [2, 1, 8, 64], strides = [1, 1, 1, 1]} : vector<2x8x8x64xf32> to vector<2x1x8x64xf32>
    %164 = vector.shape_cast %163 : vector<2x1x8x64xf32> to vector<2x8x64xf32>
    %165 = arith.addf %162, %164 : vector<2x8x64xf32>
    %cst_40 = arith.constant dense<0.000000e+00> : vector<2x64xf32>
    %166 = vector.multi_reduction <add>, %165, %cst_40 [1] : vector<2x8x64xf32> to vector<2x64xf32>
    %167 = vector.shape_cast %166 : vector<2x64xf32> to vector<2x1x64xf32>
    %168 = tpu.concatenate %111, %119, %127, %135, %143, %151, %159, %167 in 1 : vector<2x1x64xf32>, vector<2x1x64xf32>, vector<2x1x64xf32>, vector<2x1x64xf32>, vector<2x1x64xf32>, vector<2x1x64xf32>, vector<2x1x64xf32>, vector<2x1x64xf32> -> vector<2x8x64xf32>
    %169 = vector.shape_cast %168 : vector<2x8x64xf32> to vector<16x64xf32>
    %c0_41 = arith.constant 0 : index
    %c0_42 = arith.constant 0 : index
    %170 = vector.load %arg10[%c0_41, %c0_42] : memref<1x64xf32, #tpu.memory_space<vmem>>, vector<1x64xf32>
    %171 = vector.broadcast %170 : vector<1x64xf32> to vector<16x64xf32>
    %172 = arith.mulf %71, %171 : vector<16x64xf32>
    %173 = arith.addf %169, %172 : vector<16x64xf32>
    %174 = arith.truncf %173 : vector<16x64xf32> to vector<16x64xbf16>
    %c0_43 = arith.constant 0 : index
    %c0_44 = arith.constant 0 : index
    %175 = vector.load %arg11[%c0_43, %c0_44] : memref<64x32xbf16, #tpu.memory_space<vmem>>, vector<64x32xbf16>
    %cst_45 = arith.constant dense<0.000000e+00> : vector<16x32xf32>
    %176 = tpu.matmul %174, %175, %cst_45 {dimension_numbers = #tpu.dot_dimension_numbers<[1], [0], [0], [1], [0, 0, 1, 1], [], []>} : vector<16x64xbf16>, vector<64x32xbf16>, vector<16x32xf32> -> vector<16x32xf32>
    %c0_46 = arith.constant 0 : index
    %c0_47 = arith.constant 0 : index
    %177 = vector.load %arg12[%c0_46, %c0_47] : memref<1x32xf32, #tpu.memory_space<vmem>>, vector<1x32xf32>
    %178 = vector.broadcast %177 : vector<1x32xf32> to vector<16x32xf32>
    %179 = arith.addf %176, %178 : vector<16x32xf32>
    %180 = arith.mulf %179, %179 : vector<16x32xf32>
    %cst_48 = arith.constant dense<0.000000e+00> : vector<16xf32>
    %181 = vector.multi_reduction <add>, %180, %cst_48 [1] : vector<16x32xf32> to vector<16xf32>
    %182 = vector.shape_cast %181 : vector<16xf32> to vector<16x1xf32>
    %cst_49 = arith.constant 3.200000e+01 : f32
    %183 = vector.broadcast %cst_49 : f32 to vector<16x1xf32>
    %184 = arith.divf %182, %183 : vector<16x1xf32>
    %cst_50 = arith.constant 9.99999974E-6 : f32
    %185 = vector.broadcast %cst_50 : f32 to vector<16x1xf32>
    %186 = arith.addf %184, %185 : vector<16x1xf32>
    %187 = math.rsqrt %186 : vector<16x1xf32>
    %188 = vector.broadcast %187 : vector<16x1xf32> to vector<16x32xf32>
    %189 = arith.mulf %179, %188 : vector<16x32xf32>
    %c0_51 = arith.constant 0 : index
    %c0_52 = arith.constant 0 : index
    %190 = vector.load %arg13[%c0_51, %c0_52] : memref<1x32xf32, #tpu.memory_space<vmem>>, vector<1x32xf32>
    %191 = vector.broadcast %190 : vector<1x32xf32> to vector<16x32xf32>
    %192 = arith.mulf %189, %191 : vector<16x32xf32>
    %193 = arith.truncf %192 : vector<16x32xf32> to vector<16x32xbf16>
    %c0_53 = arith.constant 0 : index
    %c0_54 = arith.constant 0 : index
    %194 = vector.load %arg14[%c0_53, %c0_54] : memref<32x64xbf16, #tpu.memory_space<vmem>>, vector<32x64xbf16>
    %cst_55 = arith.constant dense<0.000000e+00> : vector<16x64xf32>
    %195 = tpu.matmul %193, %194, %cst_55 {dimension_numbers = #tpu.dot_dimension_numbers<[1], [0], [0], [1], [0, 0, 1, 1], [], []>} : vector<16x32xbf16>, vector<32x64xbf16>, vector<16x64xf32> -> vector<16x64xf32>
    %c0_56 = arith.constant 0 : index
    %c0_57 = arith.constant 0 : index
    %196 = vector.load %arg15[%c0_56, %c0_57] : memref<1x64xf32, #tpu.memory_space<vmem>>, vector<1x64xf32>
    %197 = vector.broadcast %196 : vector<1x64xf32> to vector<16x64xf32>
    %198 = arith.addf %195, %197 : vector<16x64xf32>
    %c1_i32_58 = arith.constant 1 : i32
    %199 = tpu.dynamic_rotate %198 by %c1_i32_58 dim 0 : vector<16x64xf32>, i32 -> vector<16x64xf32>
    %cst_59 = arith.constant 0.000000e+00 : f32
    %200 = vector.shape_cast %18 : vector<16x1xi1> to vector<16x1xi1>
    %201 = vector.broadcast %200 : vector<16x1xi1> to vector<16x64xi1>
    %202 = vector.broadcast %cst_59 : f32 to vector<16x64xf32>
    %203 = arith.select %201, %202, %199 : vector<16x64xi1>, vector<16x64xf32>
    %c15_i32_60 = arith.constant 15 : i32
    %204 = tpu.dynamic_rotate %198 by %c15_i32_60 dim 0 : vector<16x64xf32>, i32 -> vector<16x64xf32>
    %cst_61 = arith.constant 0.000000e+00 : f32
    %205 = vector.shape_cast %20 : vector<16x1xi1> to vector<16x1xi1>
    %206 = vector.broadcast %205 : vector<16x1xi1> to vector<16x64xi1>
    %207 = vector.broadcast %cst_61 : f32 to vector<16x64xf32>
    %208 = arith.select %206, %207, %204 : vector<16x64xi1>, vector<16x64xf32>
    %c0_62 = arith.constant 0 : index
    %c0_63 = arith.constant 0 : index
    %209 = vector.load %arg16[%c0_62, %c0_63] : memref<3x64xf32, #tpu.memory_space<vmem>>, vector<3x64xf32>
    %210 = vector.extract_strided_slice %209 {offsets = [0, 0], sizes = [1, 64], strides = [1, 1]} : vector<3x64xf32> to vector<1x64xf32>
    %211 = vector.broadcast %210 : vector<1x64xf32> to vector<16x64xf32>
    %212 = arith.mulf %203, %211 : vector<16x64xf32>
    %213 = vector.extract_strided_slice %209 {offsets = [1, 0], sizes = [1, 64], strides = [1, 1]} : vector<3x64xf32> to vector<1x64xf32>
    %214 = vector.broadcast %213 : vector<1x64xf32> to vector<16x64xf32>
    %215 = arith.mulf %198, %214 : vector<16x64xf32>
    %216 = arith.addf %212, %215 : vector<16x64xf32>
    %217 = vector.extract_strided_slice %209 {offsets = [2, 0], sizes = [1, 64], strides = [1, 1]} : vector<3x64xf32> to vector<1x64xf32>
    %218 = vector.broadcast %217 : vector<1x64xf32> to vector<16x64xf32>
    %219 = arith.mulf %208, %218 : vector<16x64xf32>
    %220 = arith.addf %216, %219 : vector<16x64xf32>
    %c0_64 = arith.constant 0 : index
    %c0_65 = arith.constant 0 : index
    %221 = vector.load %arg17[%c0_64, %c0_65] : memref<1x64xf32, #tpu.memory_space<vmem>>, vector<1x64xf32>
    %222 = vector.broadcast %221 : vector<1x64xf32> to vector<16x64xf32>
    %223 = arith.addf %220, %222 : vector<16x64xf32>
    %224 = arith.negf %223 : vector<16x64xf32>
    %225 = math.exp %224 : vector<16x64xf32>
    %cst_66 = arith.constant 1.000000e+00 : f32
    %226 = vector.broadcast %cst_66 : f32 to vector<16x64xf32>
    %227 = arith.addf %226, %225 : vector<16x64xf32>
    %228 = arith.divf %226, %227 : vector<16x64xf32>
    %229 = arith.mulf %223, %228 : vector<16x64xf32>
    %230 = arith.truncf %229 : vector<16x64xf32> to vector<16x64xbf16>
    %c0_67 = arith.constant 0 : index
    %c0_68 = arith.constant 0 : index
    %231 = vector.load %arg18[%c0_67, %c0_68] : memref<64x72xbf16, #tpu.memory_space<vmem>>, vector<64x72xbf16>
    %cst_69 = arith.constant dense<0.000000e+00> : vector<16x72xf32>
    %232 = tpu.matmul %230, %231, %cst_69 {dimension_numbers = #tpu.dot_dimension_numbers<[1], [0], [0], [1], [0, 0, 1, 1], [], []>} : vector<16x64xbf16>, vector<64x72xbf16>, vector<16x72xf32> -> vector<16x72xf32>
    %c0_70 = arith.constant 0 : index
    %c0_71 = arith.constant 0 : index
    %233 = vector.load %arg19[%c0_70, %c0_71] : memref<1x72xf32, #tpu.memory_space<vmem>>, vector<1x72xf32>
    %234 = vector.broadcast %233 : vector<1x72xf32> to vector<16x72xf32>
    %235 = arith.addf %232, %234 : vector<16x72xf32>
    %236 = vector.extract_strided_slice %235 {offsets = [0, 0], sizes = [16, 64], strides = [1, 1]} : vector<16x72xf32> to vector<16x64xf32>
    %237 = vector.extract_strided_slice %235 {offsets = [0, 64], sizes = [16, 8], strides = [1, 1]} : vector<16x72xf32> to vector<16x8xf32>
    %cst_72 = arith.constant 2.000000e+01 : f32
    %238 = vector.broadcast %cst_72 : f32 to vector<16x64xf32>
    %239 = arith.cmpf ogt, %236, %238 : vector<16x64xf32>
    %cst_73 = arith.constant 2.000000e+01 : f32
    %240 = vector.broadcast %cst_73 : f32 to vector<16x64xf32>
    %241 = arith.minimumf %236, %240 : vector<16x64xf32>
    %242 = math.exp %241 : vector<16x64xf32>
    %243 = math.log1p %242 : vector<16x64xf32>
    %244 = arith.select %239, %236, %243 : vector<16x64xi1>, vector<16x64xf32>
    %c0_74 = arith.constant 0 : index
    %c0_75 = arith.constant 0 : index
    %245 = vector.load %arg20[%c0_74, %c0_75] : memref<8x64xf32, #tpu.memory_space<vmem>>, vector<8x64xf32>
    %246 = math.exp %245 : vector<8x64xf32>
    %cst_76 = arith.constant 0.000000e+00 : f32
    %247 = vector.broadcast %cst_76 : f32 to vector<8x64xf32>
    %248 = arith.subf %247, %246 : vector<8x64xf32>
    %249 = vector.shape_cast %244 : vector<16x64xf32> to vector<2x8x1x64xf32>
    %250 = arith.mulf %244, %229 : vector<16x64xf32>
    %251 = vector.shape_cast %250 : vector<16x64xf32> to vector<2x8x1x64xf32>
    %252 = vector.shape_cast %237 : vector<16x8xf32> to vector<2x8x8x1xf32>
    %253 = vector.shape_cast %248 : vector<8x64xf32> to vector<1x1x8x64xf32>
    %254 = vector.broadcast %249 : vector<2x8x1x64xf32> to vector<2x8x8x64xf32>
    %255 = vector.broadcast %253 : vector<1x1x8x64xf32> to vector<2x8x8x64xf32>
    %256 = arith.mulf %254, %255 : vector<2x8x8x64xf32>
    %257 = math.exp %256 : vector<2x8x8x64xf32>
    %258 = vector.broadcast %251 : vector<2x8x1x64xf32> to vector<2x8x8x64xf32>
    %259 = vector.broadcast %252 : vector<2x8x8x1xf32> to vector<2x8x8x64xf32>
    %260 = arith.mulf %258, %259 : vector<2x8x8x64xf32>
    %cst_77 = arith.constant 0.000000e+00 : f32
    %261 = vector.broadcast %cst_77 : f32 to vector<2x8x64xf32>
    %262 = vector.extract_strided_slice %257 {offsets = [0, 0, 0, 0], sizes = [2, 1, 8, 64], strides = [1, 1, 1, 1]} : vector<2x8x8x64xf32> to vector<2x1x8x64xf32>
    %263 = vector.shape_cast %262 : vector<2x1x8x64xf32> to vector<2x8x64xf32>
    %264 = arith.mulf %263, %261 : vector<2x8x64xf32>
    %265 = vector.extract_strided_slice %260 {offsets = [0, 0, 0, 0], sizes = [2, 1, 8, 64], strides = [1, 1, 1, 1]} : vector<2x8x8x64xf32> to vector<2x1x8x64xf32>
    %266 = vector.shape_cast %265 : vector<2x1x8x64xf32> to vector<2x8x64xf32>
    %267 = arith.addf %264, %266 : vector<2x8x64xf32>
    %cst_78 = arith.constant dense<0.000000e+00> : vector<2x64xf32>
    %268 = vector.multi_reduction <add>, %267, %cst_78 [1] : vector<2x8x64xf32> to vector<2x64xf32>
    %269 = vector.shape_cast %268 : vector<2x64xf32> to vector<2x1x64xf32>
    %270 = vector.extract_strided_slice %257 {offsets = [0, 1, 0, 0], sizes = [2, 1, 8, 64], strides = [1, 1, 1, 1]} : vector<2x8x8x64xf32> to vector<2x1x8x64xf32>
    %271 = vector.shape_cast %270 : vector<2x1x8x64xf32> to vector<2x8x64xf32>
    %272 = arith.mulf %271, %267 : vector<2x8x64xf32>
    %273 = vector.extract_strided_slice %260 {offsets = [0, 1, 0, 0], sizes = [2, 1, 8, 64], strides = [1, 1, 1, 1]} : vector<2x8x8x64xf32> to vector<2x1x8x64xf32>
    %274 = vector.shape_cast %273 : vector<2x1x8x64xf32> to vector<2x8x64xf32>
    %275 = arith.addf %272, %274 : vector<2x8x64xf32>
    %cst_79 = arith.constant dense<0.000000e+00> : vector<2x64xf32>
    %276 = vector.multi_reduction <add>, %275, %cst_79 [1] : vector<2x8x64xf32> to vector<2x64xf32>
    %277 = vector.shape_cast %276 : vector<2x64xf32> to vector<2x1x64xf32>
    %278 = vector.extract_strided_slice %257 {offsets = [0, 2, 0, 0], sizes = [2, 1, 8, 64], strides = [1, 1, 1, 1]} : vector<2x8x8x64xf32> to vector<2x1x8x64xf32>
    %279 = vector.shape_cast %278 : vector<2x1x8x64xf32> to vector<2x8x64xf32>
    %280 = arith.mulf %279, %275 : vector<2x8x64xf32>
    %281 = vector.extract_strided_slice %260 {offsets = [0, 2, 0, 0], sizes = [2, 1, 8, 64], strides = [1, 1, 1, 1]} : vector<2x8x8x64xf32> to vector<2x1x8x64xf32>
    %282 = vector.shape_cast %281 : vector<2x1x8x64xf32> to vector<2x8x64xf32>
    %283 = arith.addf %280, %282 : vector<2x8x64xf32>
    %cst_80 = arith.constant dense<0.000000e+00> : vector<2x64xf32>
    %284 = vector.multi_reduction <add>, %283, %cst_80 [1] : vector<2x8x64xf32> to vector<2x64xf32>
    %285 = vector.shape_cast %284 : vector<2x64xf32> to vector<2x1x64xf32>
    %286 = vector.extract_strided_slice %257 {offsets = [0, 3, 0, 0], sizes = [2, 1, 8, 64], strides = [1, 1, 1, 1]} : vector<2x8x8x64xf32> to vector<2x1x8x64xf32>
    %287 = vector.shape_cast %286 : vector<2x1x8x64xf32> to vector<2x8x64xf32>
    %288 = arith.mulf %287, %283 : vector<2x8x64xf32>
    %289 = vector.extract_strided_slice %260 {offsets = [0, 3, 0, 0], sizes = [2, 1, 8, 64], strides = [1, 1, 1, 1]} : vector<2x8x8x64xf32> to vector<2x1x8x64xf32>
    %290 = vector.shape_cast %289 : vector<2x1x8x64xf32> to vector<2x8x64xf32>
    %291 = arith.addf %288, %290 : vector<2x8x64xf32>
    %cst_81 = arith.constant dense<0.000000e+00> : vector<2x64xf32>
    %292 = vector.multi_reduction <add>, %291, %cst_81 [1] : vector<2x8x64xf32> to vector<2x64xf32>
    %293 = vector.shape_cast %292 : vector<2x64xf32> to vector<2x1x64xf32>
    %294 = vector.extract_strided_slice %257 {offsets = [0, 4, 0, 0], sizes = [2, 1, 8, 64], strides = [1, 1, 1, 1]} : vector<2x8x8x64xf32> to vector<2x1x8x64xf32>
    %295 = vector.shape_cast %294 : vector<2x1x8x64xf32> to vector<2x8x64xf32>
    %296 = arith.mulf %295, %291 : vector<2x8x64xf32>
    %297 = vector.extract_strided_slice %260 {offsets = [0, 4, 0, 0], sizes = [2, 1, 8, 64], strides = [1, 1, 1, 1]} : vector<2x8x8x64xf32> to vector<2x1x8x64xf32>
    %298 = vector.shape_cast %297 : vector<2x1x8x64xf32> to vector<2x8x64xf32>
    %299 = arith.addf %296, %298 : vector<2x8x64xf32>
    %cst_82 = arith.constant dense<0.000000e+00> : vector<2x64xf32>
    %300 = vector.multi_reduction <add>, %299, %cst_82 [1] : vector<2x8x64xf32> to vector<2x64xf32>
    %301 = vector.shape_cast %300 : vector<2x64xf32> to vector<2x1x64xf32>
    %302 = vector.extract_strided_slice %257 {offsets = [0, 5, 0, 0], sizes = [2, 1, 8, 64], strides = [1, 1, 1, 1]} : vector<2x8x8x64xf32> to vector<2x1x8x64xf32>
    %303 = vector.shape_cast %302 : vector<2x1x8x64xf32> to vector<2x8x64xf32>
    %304 = arith.mulf %303, %299 : vector<2x8x64xf32>
    %305 = vector.extract_strided_slice %260 {offsets = [0, 5, 0, 0], sizes = [2, 1, 8, 64], strides = [1, 1, 1, 1]} : vector<2x8x8x64xf32> to vector<2x1x8x64xf32>
    %306 = vector.shape_cast %305 : vector<2x1x8x64xf32> to vector<2x8x64xf32>
    %307 = arith.addf %304, %306 : vector<2x8x64xf32>
    %cst_83 = arith.constant dense<0.000000e+00> : vector<2x64xf32>
    %308 = vector.multi_reduction <add>, %307, %cst_83 [1] : vector<2x8x64xf32> to vector<2x64xf32>
    %309 = vector.shape_cast %308 : vector<2x64xf32> to vector<2x1x64xf32>
    %310 = vector.extract_strided_slice %257 {offsets = [0, 6, 0, 0], sizes = [2, 1, 8, 64], strides = [1, 1, 1, 1]} : vector<2x8x8x64xf32> to vector<2x1x8x64xf32>
    %311 = vector.shape_cast %310 : vector<2x1x8x64xf32> to vector<2x8x64xf32>
    %312 = arith.mulf %311, %307 : vector<2x8x64xf32>
    %313 = vector.extract_strided_slice %260 {offsets = [0, 6, 0, 0], sizes = [2, 1, 8, 64], strides = [1, 1, 1, 1]} : vector<2x8x8x64xf32> to vector<2x1x8x64xf32>
    %314 = vector.shape_cast %313 : vector<2x1x8x64xf32> to vector<2x8x64xf32>
    %315 = arith.addf %312, %314 : vector<2x8x64xf32>
    %cst_84 = arith.constant dense<0.000000e+00> : vector<2x64xf32>
    %316 = vector.multi_reduction <add>, %315, %cst_84 [1] : vector<2x8x64xf32> to vector<2x64xf32>
    %317 = vector.shape_cast %316 : vector<2x64xf32> to vector<2x1x64xf32>
    %318 = vector.extract_strided_slice %257 {offsets = [0, 7, 0, 0], sizes = [2, 1, 8, 64], strides = [1, 1, 1, 1]} : vector<2x8x8x64xf32> to vector<2x1x8x64xf32>
    %319 = vector.shape_cast %318 : vector<2x1x8x64xf32> to vector<2x8x64xf32>
    %320 = arith.mulf %319, %315 : vector<2x8x64xf32>
    %321 = vector.extract_strided_slice %260 {offsets = [0, 7, 0, 0], sizes = [2, 1, 8, 64], strides = [1, 1, 1, 1]} : vector<2x8x8x64xf32> to vector<2x1x8x64xf32>
    %322 = vector.shape_cast %321 : vector<2x1x8x64xf32> to vector<2x8x64xf32>
    %323 = arith.addf %320, %322 : vector<2x8x64xf32>
    %cst_85 = arith.constant dense<0.000000e+00> : vector<2x64xf32>
    %324 = vector.multi_reduction <add>, %323, %cst_85 [1] : vector<2x8x64xf32> to vector<2x64xf32>
    %325 = vector.shape_cast %324 : vector<2x64xf32> to vector<2x1x64xf32>
    %326 = tpu.concatenate %269, %277, %285, %293, %301, %309, %317, %325 in 1 : vector<2x1x64xf32>, vector<2x1x64xf32>, vector<2x1x64xf32>, vector<2x1x64xf32>, vector<2x1x64xf32>, vector<2x1x64xf32>, vector<2x1x64xf32>, vector<2x1x64xf32> -> vector<2x8x64xf32>
    %327 = vector.shape_cast %326 : vector<2x8x64xf32> to vector<16x64xf32>
    %c0_86 = arith.constant 0 : index
    %c0_87 = arith.constant 0 : index
    %328 = vector.load %arg21[%c0_86, %c0_87] : memref<1x64xf32, #tpu.memory_space<vmem>>, vector<1x64xf32>
    %329 = vector.broadcast %328 : vector<1x64xf32> to vector<16x64xf32>
    %330 = arith.mulf %229, %329 : vector<16x64xf32>
    %331 = arith.addf %327, %330 : vector<16x64xf32>
    %332 = arith.truncf %331 : vector<16x64xf32> to vector<16x64xbf16>
    %c0_88 = arith.constant 0 : index
    %c0_89 = arith.constant 0 : index
    %333 = vector.load %arg22[%c0_88, %c0_89] : memref<64x32xbf16, #tpu.memory_space<vmem>>, vector<64x32xbf16>
    %cst_90 = arith.constant dense<0.000000e+00> : vector<16x32xf32>
    %334 = tpu.matmul %332, %333, %cst_90 {dimension_numbers = #tpu.dot_dimension_numbers<[1], [0], [0], [1], [0, 0, 1, 1], [], []>} : vector<16x64xbf16>, vector<64x32xbf16>, vector<16x32xf32> -> vector<16x32xf32>
    %c0_91 = arith.constant 0 : index
    %c0_92 = arith.constant 0 : index
    %335 = vector.load %arg23[%c0_91, %c0_92] : memref<1x32xf32, #tpu.memory_space<vmem>>, vector<1x32xf32>
    %336 = vector.broadcast %335 : vector<1x32xf32> to vector<16x32xf32>
    %337 = arith.addf %334, %336 : vector<16x32xf32>
    %338 = arith.mulf %337, %337 : vector<16x32xf32>
    %cst_93 = arith.constant dense<0.000000e+00> : vector<16xf32>
    %339 = vector.multi_reduction <add>, %338, %cst_93 [1] : vector<16x32xf32> to vector<16xf32>
    %340 = vector.shape_cast %339 : vector<16xf32> to vector<16x1xf32>
    %cst_94 = arith.constant 3.200000e+01 : f32
    %341 = vector.broadcast %cst_94 : f32 to vector<16x1xf32>
    %342 = arith.divf %340, %341 : vector<16x1xf32>
    %cst_95 = arith.constant 9.99999974E-6 : f32
    %343 = vector.broadcast %cst_95 : f32 to vector<16x1xf32>
    %344 = arith.addf %342, %343 : vector<16x1xf32>
    %345 = math.rsqrt %344 : vector<16x1xf32>
    %346 = vector.broadcast %345 : vector<16x1xf32> to vector<16x32xf32>
    %347 = arith.mulf %337, %346 : vector<16x32xf32>
    %c0_96 = arith.constant 0 : index
    %c0_97 = arith.constant 0 : index
    %348 = vector.load %arg24[%c0_96, %c0_97] : memref<1x32xf32, #tpu.memory_space<vmem>>, vector<1x32xf32>
    %349 = vector.broadcast %348 : vector<1x32xf32> to vector<16x32xf32>
    %350 = arith.mulf %347, %349 : vector<16x32xf32>
    %351 = vector.shape_cast %350 : vector<16x32xf32> to vector<2x8x32xf32>
    %cst_98 = arith.constant dense<0.000000e+00> : vector<2x32xf32>
    %352 = vector.multi_reduction <add>, %351, %cst_98 [1] : vector<2x8x32xf32> to vector<2x32xf32>
    %cst_99 = arith.constant 8.000000e+00 : f32
    %353 = vector.broadcast %cst_99 : f32 to vector<2x32xf32>
    %354 = arith.divf %352, %353 : vector<2x32xf32>
    %355 = arith.truncf %354 : vector<2x32xf32> to vector<2x32xbf16>
    %c0_100 = arith.constant 0 : index
    %c0_101 = arith.constant 0 : index
    %356 = vector.load %arg25[%c0_100, %c0_101] : memref<32x128xbf16, #tpu.memory_space<vmem>>, vector<32x128xbf16>
    %cst_102 = arith.constant dense<0.000000e+00> : vector<2x128xf32>
    %357 = tpu.matmul %355, %356, %cst_102 {dimension_numbers = #tpu.dot_dimension_numbers<[1], [0], [0], [1], [0, 0, 1, 1], [], []>} : vector<2x32xbf16>, vector<32x128xbf16>, vector<2x128xf32> -> vector<2x128xf32>
    %c0_103 = arith.constant 0 : index
    %c0_104 = arith.constant 0 : index
    %358 = vector.load %arg26[%c0_103, %c0_104] : memref<1x128xf32, #tpu.memory_space<vmem>>, vector<1x128xf32>
    %359 = vector.broadcast %358 : vector<1x128xf32> to vector<2x128xf32>
    %360 = arith.addf %357, %359 : vector<2x128xf32>
    %c0_105 = arith.constant 0 : index
    %c0_106 = arith.constant 0 : index
    %361 = vector.load %arg27[%c0_105, %c0_106] : memref<2x128xf32, #tpu.memory_space<vmem>>, vector<2x128xf32>
    tpu.vector_store %arg27[%c0_105, %c0_106], %360 {strides = array<i32>} : memref<2x128xf32, #tpu.memory_space<vmem>>, vector<2x128xf32>,
    return
  }
  func.func @transform_0(%arg0: i32) -> (i32, i32) {
    %c0_i32 = arith.constant 0 : i32
    %c0_i32_0 = arith.constant 0 : i32
    return %arg0, %c0_i32 : i32, i32
  }
  func.func @transform_1(%arg0: i32) -> (i32, i32) {
    %c0_i32 = arith.constant 0 : i32
    %c0_i32_0 = arith.constant 0 : i32
    %c0_i32_1 = arith.constant 0 : i32
    return %c0_i32, %c0_i32_0 : i32, i32
  }
  func.func @transform_2(%arg0: i32) -> (i32, i32) {
    %c0_i32 = arith.constant 0 : i32
    %c0_i32_0 = arith.constant 0 : i32
    %c0_i32_1 = arith.constant 0 : i32
    return %c0_i32, %c0_i32_0 : i32, i32
  }
  func.func @transform_3(%arg0: i32) -> (i32, i32) {
    %c0_i32 = arith.constant 0 : i32
    %c0_i32_0 = arith.constant 0 : i32
    %c0_i32_1 = arith.constant 0 : i32
    return %c0_i32, %c0_i32_0 : i32, i32
  }
  func.func @transform_4(%arg0: i32) -> (i32, i32) {
    %c0_i32 = arith.constant 0 : i32
    %c0_i32_0 = arith.constant 0 : i32
    %c0_i32_1 = arith.constant 0 : i32
    return %c0_i32, %c0_i32_0 : i32, i32
  }
  func.func @transform_5(%arg0: i32) -> (i32, i32) {
    %c0_i32 = arith.constant 0 : i32
    %c0_i32_0 = arith.constant 0 : i32
    %c0_i32_1 = arith.constant 0 : i32
    return %c0_i32, %c0_i32_0 : i32, i32
  }
  func.func @transform_6(%arg0: i32) -> (i32, i32) {
    %c0_i32 = arith.constant 0 : i32
    %c0_i32_0 = arith.constant 0 : i32
    %c0_i32_1 = arith.constant 0 : i32
    return %c0_i32, %c0_i32_0 : i32, i32
  }
  func.func @transform_7(%arg0: i32) -> (i32, i32) {
    %c0_i32 = arith.constant 0 : i32
    %c0_i32_0 = arith.constant 0 : i32
    %c0_i32_1 = arith.constant 0 : i32
    return %c0_i32, %c0_i32_0 : i32, i32
  }
  func.func @transform_8(%arg0: i32) -> (i32, i32) {
    %c0_i32 = arith.constant 0 : i32
    %c0_i32_0 = arith.constant 0 : i32
    %c0_i32_1 = arith.constant 0 : i32
    return %c0_i32, %c0_i32_0 : i32, i32
  }
  func.func @transform_9(%arg0: i32) -> (i32, i32) {
    %c0_i32 = arith.constant 0 : i32
    %c0_i32_0 = arith.constant 0 : i32
    %c0_i32_1 = arith.constant 0 : i32
    return %c0_i32, %c0_i32_0 : i32, i32
  }
  func.func @transform_10(%arg0: i32) -> (i32, i32) {
    %c0_i32 = arith.constant 0 : i32
    %c0_i32_0 = arith.constant 0 : i32
    %c0_i32_1 = arith.constant 0 : i32
    return %c0_i32, %c0_i32_0 : i32, i32
  }
  func.func @transform_11(%arg0: i32) -> (i32, i32) {
    %c0_i32 = arith.constant 0 : i32
    %c0_i32_0 = arith.constant 0 : i32
    %c0_i32_1 = arith.constant 0 : i32
    return %c0_i32, %c0_i32_0 : i32, i32
  }
  func.func @transform_12(%arg0: i32) -> (i32, i32) {
    %c0_i32 = arith.constant 0 : i32
    %c0_i32_0 = arith.constant 0 : i32
    %c0_i32_1 = arith.constant 0 : i32
    return %c0_i32, %c0_i32_0 : i32, i32
  }
  func.func @transform_13(%arg0: i32) -> (i32, i32) {
    %c0_i32 = arith.constant 0 : i32
    %c0_i32_0 = arith.constant 0 : i32
    %c0_i32_1 = arith.constant 0 : i32
    return %c0_i32, %c0_i32_0 : i32, i32
  }
  func.func @transform_14(%arg0: i32) -> (i32, i32) {
    %c0_i32 = arith.constant 0 : i32
    %c0_i32_0 = arith.constant 0 : i32
    %c0_i32_1 = arith.constant 0 : i32
    return %c0_i32, %c0_i32_0 : i32, i32
  }
  func.func @transform_15(%arg0: i32) -> (i32, i32) {
    %c0_i32 = arith.constant 0 : i32
    %c0_i32_0 = arith.constant 0 : i32
    %c0_i32_1 = arith.constant 0 : i32
    return %c0_i32, %c0_i32_0 : i32, i32
  }
  func.func @transform_16(%arg0: i32) -> (i32, i32) {
    %c0_i32 = arith.constant 0 : i32
    %c0_i32_0 = arith.constant 0 : i32
    %c0_i32_1 = arith.constant 0 : i32
    return %c0_i32, %c0_i32_0 : i32, i32
  }
  func.func @transform_17(%arg0: i32) -> (i32, i32) {
    %c0_i32 = arith.constant 0 : i32
    %c0_i32_0 = arith.constant 0 : i32
    %c0_i32_1 = arith.constant 0 : i32
    return %c0_i32, %c0_i32_0 : i32, i32
  }
  func.func @transform_18(%arg0: i32) -> (i32, i32) {
    %c0_i32 = arith.constant 0 : i32
    %c0_i32_0 = arith.constant 0 : i32
    %c0_i32_1 = arith.constant 0 : i32
    return %c0_i32, %c0_i32_0 : i32, i32
  }
  func.func @transform_19(%arg0: i32) -> (i32, i32) {
    %c0_i32 = arith.constant 0 : i32
    %c0_i32_0 = arith.constant 0 : i32
    %c0_i32_1 = arith.constant 0 : i32
    return %c0_i32, %c0_i32_0 : i32, i32
  }
  func.func @transform_20(%arg0: i32) -> (i32, i32) {
    %c0_i32 = arith.constant 0 : i32
    %c0_i32_0 = arith.constant 0 : i32
    %c0_i32_1 = arith.constant 0 : i32
    return %c0_i32, %c0_i32_0 : i32, i32
  }
  func.func @transform_21(%arg0: i32) -> (i32, i32) {
    %c0_i32 = arith.constant 0 : i32
    %c0_i32_0 = arith.constant 0 : i32
    %c0_i32_1 = arith.constant 0 : i32
    return %c0_i32, %c0_i32_0 : i32, i32
  }
  func.func @transform_22(%arg0: i32) -> (i32, i32) {
    %c0_i32 = arith.constant 0 : i32
    %c0_i32_0 = arith.constant 0 : i32
    %c0_i32_1 = arith.constant 0 : i32
    return %c0_i32, %c0_i32_0 : i32, i32
  }
  func.func @transform_23(%arg0: i32) -> (i32, i32) {
    %c0_i32 = arith.constant 0 : i32
    %c0_i32_0 = arith.constant 0 : i32
    %c0_i32_1 = arith.constant 0 : i32
    return %c0_i32, %c0_i32_0 : i32, i32
  }
  func.func @transform_24(%arg0: i32) -> (i32, i32) {
    %c0_i32 = arith.constant 0 : i32
    %c0_i32_0 = arith.constant 0 : i32
    %c0_i32_1 = arith.constant 0 : i32
    return %c0_i32, %c0_i32_0 : i32, i32
  }
  func.func @transform_25(%arg0: i32) -> (i32, i32) {
    %c0_i32 = arith.constant 0 : i32
    %c0_i32_0 = arith.constant 0 : i32
    %c0_i32_1 = arith.constant 0 : i32
    return %c0_i32, %c0_i32_0 : i32, i32
  }
  func.func @transform_26(%arg0: i32) -> (i32, i32) {
    %c0_i32 = arith.constant 0 : i32
    %c0_i32_0 = arith.constant 0 : i32
    return %arg0, %c0_i32 : i32, i32
  }
}

</mosaic_0001>

<bundles_post_ra>
// kernel: tpu_custom_call.1
= control target key start
LH: loop header
LB: loop body
LE: loop exit
PB: predicated region body
PF: predicated region fallthrough
CT: control target
= control target key end

     0   :  { %s3302_s0 = inlined_call_operand.vmem [shape: f32[16,32], index: 0, kind: input, shape index: {}]   ;;  %s3303_s1 = inlined_call_operand.hbm [shape: f32[1,32], index: 1, kind: input, shape index: {}]   ;;  %s3304_s2 = inlined_call_operand.hbm [shape: bf16[32,64], index: 2, kind: input, shape index: {}]   ;;  %s3305_s3 = inlined_call_operand.vmem [shape: f32[1,64], index: 3, kind: input, shape index: {}]   ;;  %s3306_s4 = inlined_call_operand.hbm [shape: f32[3,64], index: 4, kind: input, shape index: {}]   ;;  %s3307_s5 = inlined_call_operand.hbm [shape: f32[1,64], index: 5, kind: input, shape index: {}]   ;;  %s3308_s6 = inlined_call_operand.vmem [shape: bf16[64,72], index: 6, kind: input, shape index: {}]   ;;  %s3309_s7 = inlined_call_operand.hbm [shape: f32[1,72], index: 7, kind: input, shape index: {}]   ;;  %s3310_s8 = inlined_call_operand.hbm [shape: f32[8,64], index: 8, kind: input, shape index: {}]   ;;  %s3311_s9 = inlined_call_operand.hbm [shape: f32[1,64], index: 9, kind: input, shape index: {}]   ;;  %s3312_s10 = inlined_call_operand.vmem [shape: bf16[64,32], index: 10, kind: input, shape index: {}]   ;;  %s3313_s11 = inlined_call_operand.hbm [shape: f32[1,32], index: 11, kind: input, shape index: {}]   ;;  %s3314_s12 = inlined_call_operand.hbm [shape: f32[1,32], index: 12, kind: input, shape index: {}]   ;;  %s3315_s13 = inlined_call_operand.hbm [shape: bf16[32,64], index: 13, kind: input, shape index: {}]   ;;  %s3316_s14 = inlined_call_operand.hbm [shape: f32[1,64], index: 14, kind: input, shape index: {}]   ;;  %s3317_s15 = inlined_call_operand.hbm [shape: f32[3,64], index: 15, kind: input, shape index: {}]   ;;  %s3318_s16 = inlined_call_operand.hbm [shape: f32[1,64], index: 16, kind: input, shape index: {}]   ;;  %s3319_s17 = inlined_call_operand.vmem [shape: bf16[64,72], index: 17, kind: input, shape index: {}]   ;;  %s3320_s18 = inlined_call_operand.hbm [shape: f32[1,72], index: 18, kind: input, shape index: {}]   ;;  %s3321_s19 = inlined_call_operand.hbm [shape: f32[8,64], index: 19, kind: input, shape index: {}]   ;;  %s3322_s20 = inlined_call_operand.vmem [shape: f32[1,64], index: 20, kind: input, shape index: {}]   ;;  %s3323_s21 = inlined_call_operand.vmem [shape: bf16[64,32], index: 21, kind: input, shape index: {}]   ;;  %s3324_s22 = inlined_call_operand.vmem [shape: f32[1,32], index: 22, kind: input, shape index: {}]   ;;  %s3325_s23 = inlined_call_operand.vmem [shape: f32[1,32], index: 23, kind: input, shape index: {}]   ;;  %s3326_s24 = inlined_call_operand.vmem [shape: bf16[32,128], index: 24, kind: input, shape index: {}]   ;;  %s3327_s25 = inlined_call_operand.vmem [shape: f32[1,128], index: 25, kind: input, shape index: {}]   ;;  %s3328_s26 = inlined_call_operand.hbm [shape: f32[2,128], index: 26, kind: output, shape index: {}]  }
   0x1   :  { %3339 = sst [smem:[#allocation36_spill]] %s3302_s0 }
   0x2   :  { %3340 = sst [smem:[#allocation37_spill]] %s3303_s1 }
   0x3   :  { %3341 = sst [smem:[#allocation38_spill]] %s3304_s2 }
   0x4   :  { %3342 = sst [smem:[#allocation39_spill]] %s3305_s3 }
   0x5   :  { %3343 = sst [smem:[#allocation40_spill]] %s3306_s4 }
   0x6   :  { %3344 = sst [smem:[#allocation41_spill]] %s3307_s5 }
   0x7   :  { %3345 = sst [smem:[#allocation42_spill]] %s3308_s6 }
   0x8   :  { %3346 = sst [smem:[#allocation43_spill]] %s3309_s7 }
   0x9   :  { %3347 = sst [smem:[#allocation44_spill]] %s3310_s8 }
   0xa   :  { %3348 = sst [smem:[#allocation45_spill]] %s3311_s9 }
   0xb   :  { %3349 = sst [smem:[#allocation46_spill]] %s3312_s10 }
   0xc   :  { %3350 = sst [smem:[#allocation47_spill]] %s3328_s26 }
   0xd   :  { %31 = vsyncpa [#allocation3], 0 }
   0xe   :  { %32 = vsyncpa [#allocation6], 0 }
   0xf   :  { %33 = vsyncpa [#allocation9], 0 }
  0x10   :  { %34 = vsyncpa [#allocation12], 0 }
  0x11   :  { %35 = vsyncpa [#allocation15], 0 }
  0x12   :  { %36 = vsyncpa [#allocation18], 0 }
  0x13   :  { %37 = vsyncpa [#allocation21], 0 }
  0x14   :  { %38 = vsyncpa [#allocation24], 0  ;;  %s3351_s7 = sld [smem:[#allocation38_spill]] }
  0x1a   :  { %s57_s28 = sshll.u32 %s3351_s7, 4  ;;  %s58_s28 = int_to_ptr.hbm [resolvable:$true] %s57_s28 }
  0x1b   :  { %39 = vsyncpa [#allocation4], 0  ;;  %s2620_s8 = smov [#allocation5]   ;;  %s3352_s9 = sld [smem:[#allocation41_spill]] }
  0x1c   :  { %s59_s4 = sshll.u32 %s2620_s8, 4  ;;  %s3332_s2 = smov 64   ;;  %s60_s4 = int_to_ptr.vmem [resolvable:$true] %s59_s4 }
  0x1d   :  { %s3333_s5 = smov 4   ;;  %s2623_s10 = smov [#allocation8]  }
  0x1e   :  { %65 = dma.hbm_to_vmem [thread:$0]  %s58_s28, 256, %s60_s4, [#allocation6], %s3332_s2, %s3332_s2, %s3333_s5  }
  0x1f   :  { %s86_s6 = sshll.u32 %s2623_s10, 4  ;;  %s3353_s3 = sld [smem:[#allocation44_spill]]  ;;  %s87_s6 = int_to_ptr.vmem [resolvable:$true] %s86_s6 }
  0x20   :  { %s132_s29 = sshll.u32 %s3313_s11, 4  ;;  %s2624_s0 = smov [#allocation11]   ;;  %s133_s29 = int_to_ptr.hbm [resolvable:$true] %s132_s29 }
  0x21   :  { %s84_s30 = sshll.u32 %s3352_s9, 4  ;;  %s110_s9 = sshll.u32 %s2624_s0, 4  ;;  %s85_s30 = int_to_ptr.hbm [resolvable:$true] %s84_s30  ;;  %s111_s9 = int_to_ptr.vmem [resolvable:$true] %s110_s9 }
  0x22   :  { %89 = dma.hbm_to_vmem [thread:$0]  %s85_s30, 16, %s87_s6, [#allocation9]  }
  0x23   :  { %s2625_s28 = smov [#allocation14]   ;;  %s153_s5 = sshll.u32 %s3315_s13, 4  ;;  %s154_s5 = int_to_ptr.hbm [resolvable:$true] %s153_s5 }
  0x24   :  { %s134_s4 = sshll.u32 %s2625_s28, 4  ;;  %s178_s6 = sshll.u32 %s3317_s15, 4  ;;  %s135_s4 = int_to_ptr.vmem [resolvable:$true] %s134_s4  ;;  %s179_s6 = int_to_ptr.hbm [resolvable:$true] %s178_s6 }
  0x25   :  { %s108_s7 = sshll.u32 %s3353_s3, 4  ;;  %s2626_s26 = smov [#allocation17]   ;;  %s109_s7 = int_to_ptr.hbm [resolvable:$true] %s108_s7 }
  0x26   :  { %113 = dma.hbm_to_vmem [thread:$0]  %s109_s7, 128, %s111_s9, [#allocation12]  }
  0x27   :  { %137 = dma.hbm_to_vmem [thread:$0]  %s133_s29, 16, %s135_s4, [#allocation15]  }
  0x28   :  { %s155_s11 = sshll.u32 %s2626_s26, 4  ;;  %s3354_s27 = smov 4   ;;  %s156_s11 = int_to_ptr.vmem [resolvable:$true] %s155_s11 }
  0x29   :  { %s3355_s3 = smov 64   ;;  %s2627_s7 = smov [#allocation20]  }
  0x2a   :  { %161 = dma.hbm_to_vmem [thread:$0]  %s154_s5, 256, %s156_s11, [#allocation18], %s3355_s3, %s3355_s3, %s3354_s27  }
  0x2b   :  { %s180_s8 = sshll.u32 %s2627_s7, 4  ;;  %s202_s13 = sshll.u32 %s3320_s18, 4  ;;  %s181_s8 = int_to_ptr.vmem [resolvable:$true] %s180_s8  ;;  %s203_s13 = int_to_ptr.hbm [resolvable:$true] %s202_s13 }
  0x2c   :  { %183 = dma.hbm_to_vmem [thread:$0]  %s179_s6, 64, %s181_s8, [#allocation21]  }
  0x2d   :  { %s3356_s15 = sld [smem:[#allocation37_spill]]  ;;  %s2628_s4 = smov [#allocation23]  }
  0x2e   :  { %s204_s10 = sshll.u32 %s2628_s4, 4  ;;  %s2629_s1 = smov [#allocation2]   ;;  %s205_s10 = int_to_ptr.vmem [resolvable:$true] %s204_s10 }
  0x2f   :  { %207 = dma.hbm_to_vmem [thread:$0]  %s203_s13, 16, %s205_s10, [#allocation24]  }
  0x30   :  { %s49_s5 = sshll.u32 %s2629_s1, 4  ;;  %s3357_s11 = sld [smem:[#allocation40_spill]]  ;;  %s50_s5 = int_to_ptr.vmem [resolvable:$true] %s49_s5 }
  0x31   :  { %s3358_s3 = sld [smem:[#allocation43_spill]]  ;;  %s2630_s8 = smov [#allocation7]  }
  0x32   :  { %s75_s0 = sshll.u32 %s2630_s8, 4  ;;  %s2631_s2 = smov [#allocation10]   ;;  %s76_s0 = int_to_ptr.vmem [resolvable:$true] %s75_s0 }
  0x33   :  { %s47_s28 = sshll.u32 %s3356_s15, 4  ;;  %s99_s13 = sshll.u32 %s2631_s2, 4  ;;  %s48_s28 = int_to_ptr.hbm [resolvable:$true] %s47_s28  ;;  %s100_s13 = int_to_ptr.vmem [resolvable:$true] %s99_s13 }
  0x34   :  { %52 = dma.hbm_to_vmem [thread:$0]  %s48_s28, 16, %s50_s5, [#allocation3]  }
  0x35   :  { %s3359_s15 = sld [smem:[#allocation45_spill]]  ;;  %s143_s1 = sshll.u32 %s3314_s12, 4  ;;  %s144_s1 = int_to_ptr.hbm [resolvable:$true] %s143_s1 }
  0x36   :  { %s73_s27 = sshll.u32 %s3357_s11, 4  ;;  %s2632_s5 = smov [#allocation13]   ;;  %s74_s27 = int_to_ptr.hbm [resolvable:$true] %s73_s27 }
  0x37   :  { %s97_s7 = sshll.u32 %s3358_s3, 4  ;;  %s121_s30 = sshll.u32 %s2632_s5, 4  ;;  %s98_s7 = int_to_ptr.hbm [resolvable:$true] %s97_s7  ;;  %s122_s30 = int_to_ptr.vmem [resolvable:$true] %s121_s30 }
  0x38   :  { %78 = dma.hbm_to_vmem [thread:$0]  %s74_s27, 64, %s76_s0, [#allocation6]  }
  0x39   :  { %102 = dma.hbm_to_vmem [thread:$0]  %s98_s7, 16, %s100_s13, [#allocation9]  }
  0x3a   :  { %s2633_s26 = smov [#allocation16]   ;;  %s167_s6 = sshll.u32 %s3316_s14, 4  ;;  %s168_s6 = int_to_ptr.hbm [resolvable:$true] %s167_s6 }
  0x3b   :  { %s119_s4 = sshll.u32 %s3359_s15, 4  ;;  %s145_s11 = sshll.u32 %s2633_s26, 4  ;;  %s120_s4 = int_to_ptr.hbm [resolvable:$true] %s119_s4  ;;  %s146_s11 = int_to_ptr.vmem [resolvable:$true] %s145_s11 }
  0x3c   :  { %124 = dma.hbm_to_vmem [thread:$0]  %s120_s4, 16, %s122_s30, [#allocation12]  }
  0x3d   :  { %148 = dma.hbm_to_vmem [thread:$0]  %s144_s1, 16, %s146_s11, [#allocation15]  }
  0x3e   :  { %s189_s8 = sshll.u32 %s3318_s16, 4  ;;  %s2634_s0 = smov [#allocation19]   ;;  %s190_s8 = int_to_ptr.hbm [resolvable:$true] %s189_s8 }
  0x3f   :  { %s169_s12 = sshll.u32 %s2634_s0, 4  ;;  %s2635_s2 = smov [#allocation22]   ;;  %s170_s12 = int_to_ptr.vmem [resolvable:$true] %s169_s12 }
  0x40   :  { %172 = dma.hbm_to_vmem [thread:$0]  %s168_s6, 16, %s170_s12, [#allocation18]  }
  0x41   :  { %s191_s13 = sshll.u32 %s2635_s2, 4  ;;  %s213_s15 = sshll.u32 %s3321_s19, 4  ;;  %s192_s13 = int_to_ptr.vmem [resolvable:$true] %s191_s13  ;;  %s214_s15 = int_to_ptr.hbm [resolvable:$true] %s213_s15 }
  0x42   :  { %194 = dma.hbm_to_vmem [thread:$0]  %s190_s8, 16, %s192_s13, [#allocation21]  }
  0x43   :  { %s2636_s14 = smov [#allocation25]  }
  0x44   :  { %s215_s4 = sshll.u32 %s2636_s14, 4  ;;  %s216_s4 = int_to_ptr.vmem [resolvable:$true] %s215_s4 }
  0x45   :  { %218 = dma.hbm_to_vmem [thread:$0]  %s214_s15, 128, %s216_s4, [#allocation24]  }
  0x46   :  { %2602 = dma.done.wait [#allocation3], 16  }
  0x47   :  { %2603 = vsyncadd [#allocation3], 4294967280 }
  0x48   :  { %2604 = dma.done.wait [#allocation6], 320  }
  0x49   :  { %2605 = vsyncadd [#allocation6], 4294966976 }
  0x4a   :  { %2606 = dma.done.wait [#allocation9], 32  }
  0x4b   :  { %2607 = vsyncadd [#allocation9], 4294967264 }
  0x4c   :  { %2608 = dma.done.wait [#allocation12], 144  }
  0x4d   :  { %2609 = vsyncadd [#allocation12], 4294967152 }
  0x4e   :  { %2610 = dma.done.wait [#allocation15], 32  }
  0x4f   :  { %2611 = vsyncadd [#allocation15], 4294967264 }
  0x50   :  { %2612 = dma.done.wait [#allocation18], 272  }
  0x51   :  { %2613 = vsyncadd [#allocation18], 4294967024 }
  0x52   :  { %2614 = dma.done.wait [#allocation21], 80  }
  0x53   :  { %2615 = vsyncadd [#allocation21], 4294967216 }
  0x54   :  { %2616 = dma.done.wait [#allocation24], 144  }
  0x55   :  { %2617 = vsyncadd [#allocation24], 4294967152  ;;  %s3360_s10 = sld [smem:[#allocation36_spill]]  ;;  %vm327_vm0 = vcmask 261120   ;;  %v2637_v6 = vmov 32.0   ;;  %v2044_v12 = vld [vmem:[#allocation5 + $0x8] sm:$0xff]  ;;  %v292_v43 = vlaneseq }
  0x56   :  { %2102 = vrcp.f32 %v2637_v6  ;;  %403 = vmatpush.bf16.msra.mxu0 %v2044_v12  ;;  %v2043_v14 = vld [vmem:[#allocation5] sm:$0xff]  ;;  %v2088_v35 = vld [vmem:[#allocation2] ss:$0 sm:$0xff]  ;;  %s3361_s26 = sld [smem:[#allocation42_spill]]  ;;  %v433_v50 = vld [vmem:[#allocation7] sm:$0x7] }
  0x57   :  { %v2848_v45 = vshrl.u32 %v292_v43, 7  ;;  %s3362_s12 = sld [smem:[#allocation39_spill]]  ;;  %v437_v54 = vperm.slane %v433_v50, 1  ;;  %v434_v61 = vperm.slane %v433_v50, 0  ;;  %v2096_v56 = vld [vmem:[#allocation22] ss:$0 sm:$0xff] }
  0x58   :  { %s3371_s29 = sld [smem:[#allocation46_spill]]  ;;  %s2639_s16 = smov [#allocation26]  }
  0x59   :  { %v294_v48 = vadd.s32 8, %v2848_v45  ;;  %v299_v51 = vand.u32 7, %v2848_v45  ;;  %vm413_vm12 = vcmp.lt.s32.totalorder %v2848_v45, 1  ;;  %vm424_vm13 = vcmp.lt.s32.totalorder %v2848_v45, 7  ;;  %s1925_s19 = sshll.u32 %s2639_s16, 4  ;;  %s3382_s1 = sld [smem:[#allocation47_spill]]  ;;  %s1926_s19 = int_to_ptr.vmem [resolvable:$true] %s1925_s19 }
  0x5a   :  { %404 = vmatpush.bf16.msra.mxu0 %v2043_v14 }
  0x5b   :  { %v323_v0 = vld [vmem:[%s3360_s10] sm:$0xff]  ;;  %v324_v2 = vld [vmem:[%s3360_s10 + $0x8] sm:$0xff]  ;;  %v306_v52 = vand.u32 7, %v294_v48  ;;  %vm2858_vm8 = vcmp.eq.s32.totalorder %v299_v51, 0  ;;  %vm2866_vm10 = vcmp.eq.s32.totalorder %v299_v51, 7 }
  0x5c   :  { %v325_v1 = vmul.f32 %v323_v0, %v323_v0  ;;  %v326_v4 = vmul.f32 %v324_v2, %v324_v2  ;;  %v2103_v7 = vpop.eup %2102  ;;  %v2048_v41 = vld [vmem:[%s3361_s26 + $0x18] sm:$0xff]  ;;  %v2047_v42 = vld [vmem:[%s3361_s26 + $0x10] sm:$0xff]  ;;  %v2046_v44 = vld [vmem:[%s3361_s26 + $0x8] sm:$0xff] }
  0x5d   :  { %v335_v8 = vmul.f32 32.0, %v2103_v7  ;;  %vm339_vm1 = vweird.f32 %v2103_v7  ;;  %538 = vmatpush.bf16.msra.mxu1 %v2048_v41  ;;  %v2045_v46 = vld [vmem:[%s3361_s26] sm:$0xff]  ;;  %vm2862_vm9 = vcmp.eq.s32.totalorder %v306_v52, 0  ;;  %vm2870_vm11 = vcmp.eq.s32.totalorder %v306_v52, 7 }
  0x5e   :  { %v328_v3 = vsel %vm327_vm0, %v325_v1, 0.0  ;;  %v331_v5 = vsel %vm327_vm0, %v326_v4, 0.0  ;;  %v2089_v49 = vld [vmem:[%s3362_s12] ss:$0 sm:$0xff] }
  0x5f   :  { %329 = vadd.xlane.f32.xlu0 %v328_v3  ;;  %v336_v9 = vsub.f32 1.0, %v335_v8  ;;  %s1927_s5 = sshll.u32 %s3382_s1, 4  ;;  %s1928_s5 = int_to_ptr.hbm [resolvable:$true] %s1927_s5 }
  0x61   :  { %v337_v10 = vmul.f32 %v2103_v7, %v336_v9  ;;  %539 = vmatpush.bf16.msra.mxu1 %v2047_v42 }
  0x63   :  { %v338_v11 = vadd.f32 %v2103_v7, %v337_v10 }
  0x65   :  { %v2834_v13 = vsel %vm339_vm1, %v2103_v7, %v338_v11  ;;  %540 = vmatpush.bf16.msra.mxu1 %v2046_v44 }
  0x67   :  { %332 = vadd.xlane.f32.xlu0 %v331_v5 }
  0x69   :  { %541 = vmatpush.bf16.msra.mxu1 %v2045_v46 }
  0xd2   :  { %v330_v15 = vpop.xlane.xlu0 %329 }
  0xd3   :  { %v341_v16 = vmul.f32 %v2834_v13, %v330_v15 }
  0xd5   :  { %v343_v17 = vadd.f32 1e-05, %v341_v16 }
  0xd7   :  { %2104 = vrsqrt.f32 %v343_v17  ;;  %vm351_vm3 = vweird.f32 %v343_v17 }
  0xda   :  { %v333_v18 = vpop.xlane.xlu0 %332 }
  0xdb   :  { %v342_v19 = vmul.f32 %v2834_v13, %v333_v18 }
  0xdd   :  { %v2105_v20 = vpop.eup %2104  ;;  %v344_v21 = vadd.f32 1e-05, %v342_v19 }
  0xde   :  { %v346_v22 = vmul.f32 %v2105_v20, %v343_v17  ;;  %vm352_vm2 = vweird.f32 %v2105_v20 }
  0xdf   :  { %2106 = vrsqrt.f32 %v344_v21  ;;  %vm353_vm4 = vmor %vm351_vm3, %vm352_vm2  ;;  %vm361_vm6 = vweird.f32 %v344_v21 }
  0xe0   :  { %v347_v23 = vmul.f32 %v2105_v20, %v346_v22 }
  0xe2   :  { %v348_v24 = vmul.f32 0.5, %v347_v23 }
  0xe4   :  { %v349_v25 = vsub.f32 1.5, %v348_v24 }
  0xe5   :  { %v2107_v26 = vpop.eup %2106 }
  0xe6   :  { %v356_v27 = vmul.f32 %v2107_v26, %v344_v21  ;;  %v350_v28 = vmul.f32 %v2105_v20, %v349_v25  ;;  %vm362_vm5 = vweird.f32 %v2107_v26 }
  0xe7   :  { %vm363_vm7 = vmor %vm361_vm6, %vm362_vm5 }
  0xe8   :  { %v357_v29 = vmul.f32 %v2107_v26, %v356_v27  ;;  %v354_v31 = vsel %vm353_vm4, %v2105_v20, %v350_v28  ;;  %v2090_v20 = vld [vmem:[#allocation8] ss:$0 sm:$0xff]  ;;  %v617_v27 = vadd.s32 64, %v2848_v45 }
  0xe9   :  { %v365_v34 = vmul.f32 %v354_v31, %v323_v0 }
  0xea   :  { %v358_v30 = vmul.f32 0.5, %v357_v29  ;;  %2087 = vset.pattern.permute.xlu0 %v617_v27  ;;  %2086 = vset.pattern.permute.xlu2 %v617_v27 }
  0xeb   :  { %v371_v38 = vmul.f32 %v2088_v35, %v365_v34  ;;  %2085 = vset.pattern.permute.xlu1 %v617_v27 }
  0xec   :  { %v359_v32 = vsub.f32 1.5, %v358_v30 }
  0xee   :  { %v360_v33 = vmul.f32 %v2107_v26, %v359_v32 }
  0xf0   :  { %v364_v36 = vsel %vm363_vm7, %v2107_v26, %v360_v33  ;;  %vm530_vm7 = vcmask 523264  }
  0xf1   :  { %v366_v37 = vmul.f32 %v364_v36, %v324_v2  ;;  %v442_v2 = vperm.slane %v433_v50, 2 }
  0xf3   :  { %v372_v39 = vmul.f32 %v2088_v35, %v366_v37 }
  0xf5   :  { %v373_v40 = vpack.c.bf16 %v372_v39, %v371_v38 }
  0xf7   :  { %1952 = vmatmul.msk.bf16.vlgmr.msra.gmra.mxu0 %vm327_vm0, %v373_v40 }
 0x174   :  { %v406_v47 = vpop.f32.mrf.mxu0 }
 0x175   :  { %v407_v53 = vadd.f32 %v2089_v49, %v406_v47 }
 0x177   :  { %v411_v62 = vrot.slane %v407_v53, 7  ;;  %v422_v63 = vrot.slane %v407_v53, 1  ;;  %v438_v11 = vmul.f32 %v437_v54, %v407_v53 }
 0x17c   :  { %v408_v55 = vpop.f32.mrf.mxu0 }
 0x17d   :  { %v409_v59 = vadd.f32 %v2089_v49, %v408_v55 }
 0x17f   :  { %v412_v0 = vrot.slane %v409_v59, 7  ;;  %v423_v1 = vrot.slane %v409_v59, 1  ;;  %v439_v15 = vmul.f32 %v437_v54, %v409_v59  ;;  %v2091_v59 = vld [vmem:[#allocation10] ss:$0 sm:$0xff] }
 0x181   :  { %v414_v3 = vsel %vm413_vm12, %v411_v62, %v412_v0  ;;  %v415_v4 = vsel %vm413_vm12, %v412_v0, %v411_v62  ;;  %v425_v5 = vsel %vm424_vm13, %v422_v63, %v423_v1  ;;  %v426_v6 = vsel %vm424_vm13, %v423_v1, %v422_v63 }
 0x182   :  { %v420_v7 = vsel %vm2858_vm8, 0.0, %v415_v4  ;;  %v421_v8 = vsel %vm2862_vm9, 0.0, %v414_v3  ;;  %v431_v9 = vsel %vm2866_vm10, 0.0, %v425_v5  ;;  %v432_v10 = vsel %vm2870_vm11, 0.0, %v426_v6 }
 0x183   :  { %v435_v12 = vmul.f32 %v434_v61, %v420_v7  ;;  %v436_v14 = vmul.f32 %v434_v61, %v421_v8  ;;  %v443_v18 = vmul.f32 %v442_v2, %v431_v9  ;;  %v444_v19 = vmul.f32 %v442_v2, %v432_v10 }
 0x185   :  { %v440_v16 = vadd.f32 %v438_v11, %v435_v12  ;;  %v441_v17 = vadd.f32 %v439_v15, %v436_v14 }
 0x187   :  { %v446_v21 = vadd.f32 %v444_v19, %v441_v17  ;;  %v445_v22 = vadd.f32 %v443_v18, %v440_v16 }
 0x189   :  { %v451_v23 = vadd.f32 %v2090_v20, %v445_v22  ;;  %v452_v24 = vadd.f32 %v2090_v20, %v446_v21 }
 0x18b   :  { %v1953_v25 = vmul.f32 -1.442695, %v451_v23  ;;  %v1954_v26 = vmul.f32 -1.442695, %v452_v24 }
 0x18d   :  { %2108 = vpow2.f32 %v1953_v25 }
 0x18e   :  { %2110 = vpow2.f32 %v1954_v26  ;;  %v576_v26 = vld [vmem:[#allocation11] sm:$0xff] }
 0x193   :  { %v2109_v28 = vpop.eup %2108 }
 0x194   :  { %v2111_v29 = vpop.eup %2110  ;;  %v459_v30 = vadd.f32 1.0, %v2109_v28 }
 0x195   :  { %v460_v31 = vadd.f32 1.0, %v2111_v29  ;;  %v577_v29 = vmul.f32 1.442695, %v576_v26 }
 0x196   :  { %2112 = vrcp.f32 %v459_v30  ;;  %v472_v37 = vand.u32 2147483648, %v459_v30  ;;  %v470_v40 = vand.u32 2147483647, %v459_v30  ;;  %vm466_vm1 = vweird.f32 %v459_v30 }
 0x197   :  { %2114 = vrcp.f32 %v460_v31  ;;  %v487_v41 = vand.u32 2147483648, %v460_v31  ;;  %v485_v43 = vand.u32 2147483647, %v460_v31  ;;  %vm481_vm3 = vweird.f32 %v460_v31 }
 0x198   :  { %v473_v46 = vor.u32 1.1754944e-38, %v472_v37  ;;  %vm471_vm4 = vcmp.eq.f32.partialorder %v470_v40, 8.507059e+37 }
 0x199   :  { %v488_v49 = vor.u32 1.1754944e-38, %v487_v41  ;;  %vm486_vm6 = vcmp.eq.f32.partialorder %v485_v43, 8.507059e+37 }
 0x19c   :  { %v2113_v32 = vpop.eup %2112 }
 0x19d   :  { %v2115_v33 = vpop.eup %2114  ;;  %v462_v34 = vmul.f32 %v2113_v32, %v459_v30  ;;  %vm467_vm14 = vweird.f32 %v2113_v32 }
 0x19e   :  { %v477_v35 = vmul.f32 %v2115_v33, %v460_v31  ;;  %vm482_vm15 = vweird.f32 %v2115_v33  ;;  %vm468_vm2 = vmor %vm466_vm1, %vm467_vm14 }
 0x19f   :  { %v463_v36 = vsub.f32 1.0, %v462_v34  ;;  %vm483_vm5 = vmor %vm481_vm3, %vm482_vm15  ;;  %vm998_vm3 = vcmask 1040384  }
 0x1a0   :  { %v478_v38 = vsub.f32 1.0, %v477_v35 }
 0x1a1   :  { %v464_v39 = vmul.f32 %v2113_v32, %v463_v36 }
 0x1a2   :  { %v479_v42 = vmul.f32 %v2115_v33, %v478_v38 }
 0x1a3   :  { %v465_v44 = vadd.f32 %v2113_v32, %v464_v39 }
 0x1a4   :  { %v480_v47 = vadd.f32 %v2115_v33, %v479_v42 }
 0x1a5   :  { %v469_v48 = vsel %vm468_vm2, %v2113_v32, %v465_v44 }
 0x1a6   :  { %v474_v50 = vsel %vm471_vm4, %v473_v46, %v469_v48  ;;  %v484_v51 = vsel %vm483_vm5, %v2115_v33, %v480_v47  ;;  %vm1001_vm4 = vcmask 1041408   ;;  %vm3338_vm5 = vcmask 1042432  }
 0x1a7   :  { %v489_v52 = vsel %vm486_vm6, %v488_v49, %v484_v51  ;;  %v2893_v53 = vmul.f32 %v474_v50, %v451_v23  ;;  %vm3337_vm6 = vcmask 1043456  }
 0x1a8   :  { %v2895_v54 = vmul.f32 %v489_v52, %v452_v24 }
 0x1aa   :  { %v493_v55 = vpack.c.bf16 %v2895_v54, %v2893_v53 }
 0x1ac   :  { %1971 = vmatmul.msk.bf16.vlgmr.msra.gmra.mxu1 %vm530_vm7, %v493_v55 }
 0x229   :  { %v543_v61 = vpop.f32.mrf.mxu1 }
 0x22a   :  { %v2900_v62 = vadd.f32 %v2091_v59, %v543_v61 }
 0x22c   :  { %v628_v63 = vperm.slane %v2900_v62, 2  ;;  %v621_v0 = vperm.slane %v2900_v62, 1  ;;  %v614_v1 = vperm.slane %v2900_v62, 0  ;;  %v635_v5 = vperm.slane %v2900_v62, 3 }
 0x22d   :  { %v642_v7 = vperm.slane %v2900_v62, 4  ;;  %v649_v11 = vperm.slane %v2900_v62, 5  ;;  %v656_v14 = vperm.slane %v2900_v62, 6  ;;  %v663_v16 = vperm.slane %v2900_v62, 7 }
 0x22e   :  { %633 = vperm.xlu0 %2087, %v628_v63   ;;  %626 = vperm.xlu2 %2086, %v621_v0   ;;  %v550_v18 = vmin.f32 %v2900_v62, 20.0  ;;  %vm548_vm15 = vcmp.gt.f32.partialorder %v2900_v62, 20.0 }
 0x22f   :  { %619 = vperm.xlu1 %2085, %v614_v1  }
 0x230   :  { %v552_v19 = vmul.f32 1.442695, %v550_v18 }
 0x231   :  { %v545_v2 = vpop.f32.mrf.mxu1 }
 0x232   :  { %v2905_v3 = vadd.f32 %v2091_v59, %v545_v2  ;;  %2116 = vpow2.f32 %v552_v19 }
 0x234   :  { %v719_v4 = vperm.slane %v2905_v3, 7  ;;  %v670_v6 = vperm.slane %v2905_v3, 0  ;;  %v684_v8 = vperm.slane %v2905_v3, 2  ;;  %v677_v9 = vperm.slane %v2905_v3, 1 }
 0x235   :  { %v691_v10 = vperm.slane %v2905_v3, 3  ;;  %v698_v12 = vperm.slane %v2905_v3, 4  ;;  %v705_v15 = vperm.slane %v2905_v3, 5  ;;  %v712_v17 = vperm.slane %v2905_v3, 6 }
 0x236   :  { %724 = vperm.xlu0 %2087, %v719_v4   ;;  %640 = vperm.xlu2 %2086, %v635_v5   ;;  %v551_v20 = vmin.f32 %v2905_v3, 20.0  ;;  %vm549_vm2 = vcmp.gt.f32.partialorder %v2905_v3, 20.0 }
 0x237   :  { %675 = vperm.xlu1 %2085, %v670_v6  }
 0x238   :  { %v554_v21 = vmul.f32 1.442695, %v551_v20  ;;  %v2117_v22 = vpop.eup %2116 }
 0x239   :  { %v556_v23 = vadd.f32 1.0, %v2117_v22  ;;  %v559_v25 = vmul.f32 -0.5, %v2117_v22  ;;  %v562_v31 = vand.u32 2147483647, %v2117_v22 }
 0x23a   :  { %2118 = vpow2.f32 %v554_v21 }
 0x23b   :  { %2120 = vlog2.f32 %v556_v23  ;;  %v560_v30 = vadd.f32 1.0, %v559_v25  ;;  %vm563_vm14 = vcmp.lt.f32.partialorder %v562_v31, 0.0004427343 }
 0x23d   :  { %v561_v33 = vmul.f32 %v2117_v22, %v560_v30 }
 0x23e   :  { %647 = vperm.xlu2 %2086, %v642_v7  }
 0x23f   :  { %689 = vperm.xlu1 %2085, %v684_v8  }
 0x240   :  { %v2119_v24 = vpop.eup %2118 }
 0x241   :  { %v565_v27 = vadd.f32 1.0, %v2119_v24  ;;  %v2121_v28 = vpop.eup %2120  ;;  %v568_v34 = vmul.f32 -0.5, %v2119_v24  ;;  %v571_v41 = vand.u32 2147483647, %v2119_v24 }
 0x242   :  { %v558_v32 = vmul.f32 0.6931472, %v2121_v28 }
 0x243   :  { %2122 = vlog2.f32 %v565_v27  ;;  %v569_v38 = vadd.f32 1.0, %v568_v34  ;;  %vm572_vm1 = vcmp.lt.f32.partialorder %v571_v41, 0.0004427343 }
 0x244   :  { %2124 = vpow2.f32 %v577_v29  ;;  %v564_v35 = vsel %vm563_vm14, %v561_v33, %v558_v32  ;;  %vm3336_vm14 = vcmask 1044480  }
 0x245   :  { %v2926_v40 = vsel %vm548_vm15, %v2900_v62, %v564_v35  ;;  %v570_v43 = vmul.f32 %v2119_v24, %v569_v38  ;;  %vm3335_vm15 = vcmask 1045504  }
 0x246   :  { %682 = vperm.xlu2 %2086, %v677_v9   ;;  %v726_v46 = vperm.slane %v2926_v40, 0  ;;  %v582_v48 = vrot.slane %v2926_v40, 1  ;;  %v583_v52 = vrot.slane %v2926_v40, 2  ;;  %v584_v0 = vrot.slane %v2926_v40, 3 }
 0x247   :  { %696 = vperm.xlu1 %2085, %v691_v10   ;;  %v585_v6 = vrot.slane %v2926_v40, 4  ;;  %v2951_v8 = vmul.f32 %v2926_v40, %v2893_v53  ;;  %v587_v22 = vrot.slane %v2926_v40, 6 }
 0x248   :  { %v727_v55 = vperm.slane %v582_v48, 0  ;;  %v728_v62 = vperm.slane %v583_v52, 0  ;;  %v729_v7 = vperm.slane %v584_v0, 0 }
 0x249   :  { %v2123_v36 = vpop.eup %2122  ;;  %v806_v18 = vperm.slane %v2951_v8, 0  ;;  %v601_v23 = vrot.slane %v2951_v8, 2 }
 0x24a   :  { %v2125_v39 = vpop.eup %2124  ;;  %v567_v42 = vmul.f32 0.6931472, %v2123_v36  ;;  %v602_v36 = vrot.slane %v2951_v8, 3 }
 0x24b   :  { %v2928_v44 = vsub.f32 0.0, %v2125_v39  ;;  %v808_v39 = vperm.slane %v601_v23, 0 }
 0x24c   :  { %v573_v47 = vsel %vm572_vm1, %v570_v43, %v567_v42  ;;  %vm3334_vm1 = vcmask 1046528  }
 0x24d   :  { %v758_v50 = vmul.f32 %v726_v46, %v2928_v44  ;;  %v2937_v51 = vsel %vm549_vm2, %v2905_v3, %v573_v47  ;;  %v759_v63 = vmul.f32 %v727_v55, %v2928_v44  ;;  %v760_v3 = vmul.f32 %v728_v62, %v2928_v44 }
 0x24e   :  { %654 = vperm.xlu2 %2086, %v649_v11   ;;  %v734_v61 = vperm.slane %v2937_v51, 0  ;;  %v589_v1 = vrot.slane %v2937_v51, 1  ;;  %v586_v11 = vrot.slane %v2926_v40, 5  ;;  %v590_v20 = vrot.slane %v2937_v51, 2 }
 0x24f   :  { %703 = vperm.xlu1 %2085, %v698_v12   ;;  %v774_v59 = vmul.f32 1.442695, %v758_v50  ;;  %v776_v5 = vmul.f32 1.442695, %v759_v63  ;;  %v2963_v27 = vmul.f32 %v2937_v51, %v2895_v54  ;;  %v732_v50 = vperm.slane %v587_v22, 0 }
 0x250   :  { %v766_v4 = vmul.f32 %v734_v61, %v2928_v44  ;;  %v735_v9 = vperm.slane %v589_v1, 0  ;;  %v731_v26 = vperm.slane %v586_v11, 0  ;;  %v736_v34 = vperm.slane %v590_v20, 0 }
 0x251   :  { %2126 = vpow2.f32 %v774_v59  ;;  %v814_v48 = vperm.slane %v2963_v27, 0  ;;  %v591_v59 = vrot.slane %v2937_v51, 3  ;;  %v603_v62 = vrot.slane %v2951_v8, 4 }
 0x252   :  { %v790_v10 = vmul.f32 1.442695, %v766_v4  ;;  %2128 = vpow2.f32 %v776_v5  ;;  %v767_v19 = vmul.f32 %v735_v9, %v2928_v44  ;;  %v763_v42 = vmul.f32 %v731_v26, %v2928_v44 }
 0x253   :  { %v768_v55 = vmul.f32 %v736_v34, %v2928_v44  ;;  %v607_v63 = vrot.slane %v2963_v27, 1  ;;  %v588_v9 = vrot.slane %v2926_v40, 7  ;;  %v810_v20 = vperm.slane %v603_v62, 0 }
 0x254   :  { %2130 = vpow2.f32 %v790_v10  ;;  %v792_v33 = vmul.f32 1.442695, %v767_v19  ;;  %v595_v62 = vrot.slane %v2937_v51, 7 }
 0x256   :  { %661 = vperm.xlu2 %2086, %v656_v14   ;;  %v778_v14 = vmul.f32 1.442695, %v760_v3 }
 0x257   :  { %710 = vperm.xlu1 %2085, %v705_v15   ;;  %v2127_v12 = vpop.eup %2126  ;;  %v730_v15 = vperm.slane %v585_v6, 0  ;;  %v784_v6 = vmul.f32 1.442695, %v763_v42 }
 0x258   :  { %v854_v25 = vmul.f32 0.0, %v2127_v12  ;;  %2132 = vpow2.f32 %v778_v14  ;;  %v2129_v35 = vpop.eup %2128  ;;  %v794_v12 = vmul.f32 1.442695, %v768_v55  ;;  %v737_v14 = vperm.slane %v591_v59, 0 }
 0x259   :  { %v762_v29 = vmul.f32 %v730_v15, %v2928_v44 }
 0x25a   :  { %v2131_v43 = vpop.eup %2130 }
 0x25b   :  { %v782_v47 = vmul.f32 1.442695, %v762_v29  ;;  %v855_v3 = vmul.f32 0.0, %v2131_v43  ;;  %v769_v29 = vmul.f32 %v737_v14, %v2928_v44 }
 0x25e   :  { %668 = vperm.xlu2 %2086, %v663_v16   ;;  %v761_v16 = vmul.f32 %v729_v7, %v2928_v44  ;;  %v2133_v61 = vpop.eup %2132  ;;  %v764_v7 = vmul.f32 %v732_v50, %v2928_v44 }
 0x25f   :  { %717 = vperm.xlu1 %2085, %v712_v17   ;;  %v600_v17 = vrot.slane %v2951_v8, 1 }
 0x260   :  { %v780_v30 = vmul.f32 1.442695, %v761_v16  ;;  %v786_v23 = vmul.f32 1.442695, %v764_v7 }
 0x261   :  { %v807_v31 = vperm.slane %v600_v17, 0  ;;  %v592_v17 = vrot.slane %v2937_v51, 4 }
 0x262   :  { %2134 = vpow2.f32 %v780_v30 }
 0x263   :  { %2136 = vpow2.f32 %v792_v33  ;;  %v738_v34 = vperm.slane %v592_v17, 0 }
 0x264   :  { %2138 = vpow2.f32 %v782_v47 }
 0x265   :  { %2140 = vpow2.f32 %v784_v6  ;;  %v770_v50 = vmul.f32 %v738_v34, %v2928_v44 }
 0x266   :  { %2142 = vpow2.f32 %v794_v12 }
 0x267   :  { %2144 = vpow2.f32 %v786_v23  ;;  %v798_v14 = vmul.f32 1.442695, %v770_v50  ;;  %v606_v23 = vrot.slane %v2951_v8, 7 }
 0x268   :  { %v2135_v15 = vpop.eup %2134 }
 0x288   :  { %v2922_v37 = vpop.permute.xlu2 %626 }
 0x289   :  { %v839_v38 = vmul.f32 %v807_v31, %v2922_v37  ;;  %v809_v37 = vperm.slane %v602_v36, 0 }
 0x290   :  { %v2932_v49 = vpop.permute.xlu2 %640 }
 0x291   :  { %v841_v19 = vmul.f32 %v809_v37, %v2932_v49  ;;  %v608_v49 = vrot.slane %v2963_v27, 2  ;;  %v605_v37 = vrot.slane %v2951_v8, 6 }
 0x298   :  { %v2944_v2 = vpop.permute.xlu2 %647 }
 0x2a0   :  { %v683_v28 = vpop.permute.xlu2 %682  ;;  %v634_v46 = vpop.permute.xlu0 %633 }
 0x2a1   :  { %v620_v21 = vpop.permute.xlu1 %619  ;;  %v840_v1 = vmul.f32 %v808_v39, %v634_v46  ;;  %v796_v46 = vmul.f32 1.442695, %v769_v29 }
 0x2a2   :  { %v838_v24 = vmul.f32 %v806_v18, %v620_v21  ;;  %v2137_v18 = vpop.eup %2136  ;;  %v815_v21 = vperm.slane %v607_v63, 0 }
 0x2a3   :  { %v2139_v30 = vpop.eup %2138  ;;  %2146 = vpow2.f32 %v796_v46 }
 0x2a4   :  { %v2966_v32 = vadd.f32 %v854_v25, %v838_v24  ;;  %v733_v24 = vperm.slane %v588_v9, 0  ;;  %v604_v25 = vrot.slane %v2951_v8, 5  ;;  %v847_v31 = vmul.f32 %v815_v21, %v683_v28  ;;  %v2141_v28 = vpop.eup %2140 }
 0x2a5   :  { %v2143_v55 = vpop.eup %2142  ;;  %v609_v9 = vrot.slane %v2963_v27, 3 }
 0x2a6   :  { %v872_v41 = vmul.f32 %v2129_v35, %v2966_v32  ;;  %v842_v35 = vmul.f32 %v810_v20, %v2944_v2  ;;  %v765_v39 = vmul.f32 %v733_v24, %v2928_v44  ;;  %v811_v42 = vperm.slane %v604_v25, 0  ;;  %v2145_v7 = vpop.eup %2144 }
 0x2a7   :  { %v594_v2 = vrot.slane %v2937_v51, 6  ;;  %v817_v24 = vperm.slane %v609_v9, 0 }
 0x2a8   :  { %v874_v52 = vadd.f32 %v872_v41, %v839_v38  ;;  %v655_v16 = vpop.permute.xlu2 %654  ;;  %v593_v41 = vrot.slane %v2937_v51, 5  ;;  %v613_v51 = vrot.slane %v2963_v27, 7 }
 0x2a9   :  { %v676_v0 = vpop.permute.xlu1 %675  ;;  %v843_v59 = vmul.f32 %v811_v42, %v655_v16  ;;  %v812_v16 = vperm.slane %v605_v37, 0  ;;  %v2147_v29 = vpop.eup %2146 }
 0x2aa   :  { %v890_v4 = vmul.f32 %v2133_v61, %v874_v52  ;;  %v846_v5 = vmul.f32 %v814_v48, %v676_v0  ;;  %v876_v47 = vsel %vm530_vm7, %v874_v52, 0.0  ;;  %v816_v48 = vperm.slane %v608_v49, 0 }
 0x2ab   :  { %v858_v52 = vsel %vm530_vm7, %v2966_v32, 0.0  ;;  %v611_v49 = vrot.slane %v2963_v27, 5 }
 0x2ac   :  { %v2979_v10 = vadd.f32 %v890_v4, %v840_v1  ;;  %v2981_v11 = vadd.f32 %v855_v3, %v846_v5  ;;  %v788_v4 = vmul.f32 1.442695, %v765_v39  ;;  %v739_v3 = vperm.slane %v593_v41, 0 }
 0x2ad   :  { %v877_v5 = vrot.slane %v876_v47, 4 }
 0x2ae   :  { %v908_v22 = vmul.f32 %v2135_v15, %v2979_v10  ;;  %v873_v40 = vmul.f32 %v2137_v18, %v2981_v11  ;;  %v740_v15 = vperm.slane %v594_v2, 0  ;;  %v741_v18 = vperm.slane %v595_v62, 0 }
 0x2af   :  { %2148 = vpow2.f32 %v788_v4  ;;  %v771_v32 = vmul.f32 %v739_v3, %v2928_v44  ;;  %v878_v21 = vadd.f32 %v877_v5, %v876_v47  ;;  %v894_v8 = vsel %vm530_vm7, %v2979_v10, 0.0 }
 0x2b0   :  { %v2988_v26 = vadd.f32 %v908_v22, %v841_v19  ;;  %v2994_v38 = vadd.f32 %v873_v40, %v847_v31  ;;  %v662_v63 = vpop.permute.xlu2 %661  ;;  %v859_v19 = vrot.slane %v858_v52, 4  ;;  %v610_v40 = vrot.slane %v2963_v27, 4 }
 0x2b1   :  { %v690_v33 = vpop.permute.xlu1 %689  ;;  %v844_v22 = vmul.f32 %v812_v16, %v662_v63  ;;  %2150 = vpow2.f32 %v798_v14  ;;  %v772_v25 = vmul.f32 %v740_v15, %v2928_v44  ;;  %v800_v39 = vmul.f32 1.442695, %v771_v32 }
 0x2b2   :  { %v926_v36 = vmul.f32 %v2139_v30, %v2988_v26  ;;  %v891_v0 = vmul.f32 %v2143_v55, %v2994_v38  ;;  %v848_v1 = vmul.f32 %v816_v48, %v690_v33  ;;  %v3018_v30 = vperm.slane %v613_v51, 0 }
 0x2b3   :  { %v773_v33 = vmul.f32 %v741_v18, %v2928_v44  ;;  %v860_v34 = vadd.f32 %v859_v19, %v858_v52  ;;  %v879_v41 = vrot.slane %v878_v21, 2  ;;  %v865_v42 = vsel %vm530_vm7, %v2981_v11, 0.0 }
 0x2b4   :  { %v2998_v43 = vadd.f32 %v926_v36, %v842_v35  ;;  %v893_v20 = vadd.f32 %v891_v0, %v848_v1  ;;  %v818_v46 = vperm.slane %v610_v40, 0  ;;  %v813_v48 = vperm.slane %v606_v23, 0 }
 0x2b5   :  { %v612_v55 = vrot.slane %v2963_v27, 6  ;;  %v802_v44 = vmul.f32 1.442695, %v772_v25  ;;  %v804_v62 = vmul.f32 1.442695, %v773_v33  ;;  %v861_v63 = vrot.slane %v860_v34, 2 }
 0x2b6   :  { %v944_v61 = vmul.f32 %v2141_v28, %v2998_v43  ;;  %v909_v35 = vmul.f32 %v2147_v29, %v893_v20  ;;  %v2149_v28 = vpop.eup %2148  ;;  %v895_v0 = vrot.slane %v894_v8, 4  ;;  %v866_v1 = vrot.slane %v865_v42, 4  ;;  %v2051_v27 = vld [vmem:[%s3371_s29 + $0x10] sm:$0xff]  ;;  %v725_v29 = vpop.permute.xlu0 %724 }
 0x2b7   :  { %v2151_v11 = vpop.eup %2150  ;;  %2152 = vpow2.f32 %v800_v39  ;;  %v880_v4 = vadd.f32 %v879_v41, %v878_v21  ;;  %v819_v5 = vperm.slane %v611_v49, 0  ;;  %v3037_v9 = vperm.slane %v612_v55, 0 }
 0x2b8   :  { %v3009_v6 = vadd.f32 %v944_v61, %v843_v59  ;;  %v669_v47 = vpop.permute.xlu2 %668  ;;  %v2052_v59 = vld [vmem:[%s3371_s29 + $0x18] sm:$0xff]  ;;  %v883_v61 = vsel %vm530_vm7, %v2994_v38, 0.0  ;;  %v912_v38 = vsel %vm530_vm7, %v2988_v26, 0.0  ;;  %2154 = vpow2.f32 %v802_v44  ;;  %v2050_v26 = vld [vmem:[%s3371_s29 + $0x8] sm:$0xff] }
 0x2b9   :  { %v697_v12 = vpop.permute.xlu1 %696  ;;  %1071 = vmatpush.bf16.msra.mxu2 %v2052_v59  ;;  %v845_v3 = vmul.f32 %v813_v48, %v669_v47  ;;  %2156 = vpow2.f32 %v804_v62  ;;  %v862_v51 = vadd.f32 %v861_v63, %v860_v34  ;;  %v896_v16 = vadd.f32 %v895_v0, %v894_v8 }
 0x2ba   :  { %v962_v17 = vmul.f32 %v2145_v7, %v3009_v6  ;;  %v849_v36 = vmul.f32 %v817_v24, %v697_v12  ;;  %v884_v7 = vrot.slane %v883_v61, 4  ;;  %v930_v12 = vsel %vm530_vm7, %v2998_v43, 0.0 }
 0x2bb   :  { %v901_v18 = vsel %vm530_vm7, %v893_v20, 0.0  ;;  %v881_v19 = vrot.slane %v880_v4, 1  ;;  %v913_v32 = vrot.slane %v912_v38, 4  ;;  %v948_v21 = vsel %vm530_vm7, %v3009_v6, 0.0 }
 0x2bc   :  { %v964_v31 = vadd.f32 %v962_v17, %v844_v22  ;;  %v911_v50 = vadd.f32 %v909_v35, %v849_v36  ;;  %v867_v17 = vadd.f32 %v866_v1, %v865_v42  ;;  %v931_v40 = vrot.slane %v930_v12, 4 }
 0x2bd   :  { %1072 = vmatpush.bf16.msra.mxu2 %v2051_v27  ;;  %v2153_v22 = vpop.eup %2152  ;;  %v885_v24 = vadd.f32 %v884_v7, %v883_v61  ;;  %v902_v49 = vrot.slane %v901_v18, 4  ;;  %v863_v39 = vrot.slane %v862_v51, 1  ;;  %v897_v41 = vrot.slane %v896_v16, 2 }
 0x2be   :  { %v980_v10 = vmul.f32 %v2149_v28, %v964_v31  ;;  %v927_v52 = vmul.f32 %v2151_v11, %v911_v50  ;;  %v919_v43 = vsel %vm530_vm7, %v911_v50, 0.0  ;;  %v966_v23 = vsel %vm530_vm7, %v964_v31, 0.0  ;;  %v2155_v36 = vpop.eup %2154  ;;  %v2049_v31 = vld [vmem:[%s3371_s29] sm:$0xff] }
 0x2bf   :  { %v949_v6 = vrot.slane %v948_v21, 4  ;;  %v920_v8 = vrot.slane %v919_v43, 4  ;;  %v2157_v42 = vpop.eup %2156  ;;  %v967_v28 = vrot.slane %v966_v23, 4  ;;  %v853_v50 = vmul.f32 %v3018_v30, %v725_v29 }
 0x2c0   :  { %v982_v14 = vadd.f32 %v980_v10, %v845_v3  ;;  %v886_v55 = vrot.slane %v885_v24, 2  ;;  %v882_v59 = vadd.f32 %v881_v19, %v880_v4  ;;  %v932_v61 = vadd.f32 %v931_v40, %v930_v12 }
 0x2c1   :  { %v704_v2 = vpop.permute.xlu1 %703  ;;  %1073 = vmatpush.bf16.msra.mxu2 %v2050_v26  ;;  %v903_v10 = vadd.f32 %v902_v49, %v901_v18  ;;  %v898_v62 = vadd.f32 %v897_v41, %v896_v16  ;;  %v950_v11 = vadd.f32 %v949_v6, %v948_v21  ;;  %v921_v63 = vadd.f32 %v920_v8, %v919_v43 }
 0x2c2   :  { %v850_v37 = vmul.f32 %v818_v46, %v704_v2  ;;  %v984_v33 = vsel %vm530_vm7, %v982_v14, 0.0  ;;  %v914_v46 = vadd.f32 %v913_v32, %v912_v38  ;;  %v868_v2 = vrot.slane %v867_v17, 2 }
 0x2c3   :  { %v985_v44 = vrot.slane %v984_v33, 4  ;;  %v864_v1 = vadd.f32 %v863_v39, %v862_v51  ;;  %v968_v3 = vadd.f32 %v967_v28, %v966_v23  ;;  %v887_v30 = vadd.f32 %v886_v55, %v885_v24 }
 0x2c4   :  { %v929_v15 = vadd.f32 %v927_v52, %v850_v37  ;;  %v915_v27 = vrot.slane %v914_v46, 2  ;;  %v933_v4 = vrot.slane %v932_v61, 2  ;;  %v904_v12 = vrot.slane %v903_v10, 2 }
 0x2c5   :  { %1074 = vmatpush.bf16.msra.mxu2 %v2049_v31  ;;  %v986_v38 = vadd.f32 %v985_v44, %v984_v33  ;;  %v899_v16 = vrot.slane %v898_v62, 1  ;;  %v999_v26 = vsel %vm998_vm3, %v864_v1, %v882_v59  ;;  %v951_v19 = vrot.slane %v950_v11, 2 }
 0x2c6   :  { %v937_v20 = vsel %vm530_vm7, %v929_v15, 0.0  ;;  %v945_v34 = vmul.f32 %v2153_v22, %v929_v15  ;;  %v922_v32 = vrot.slane %v921_v63, 2  ;;  %v916_v51 = vadd.f32 %v915_v27, %v914_v46 }
 0x2c7   :  { %v938_v47 = vrot.slane %v937_v20, 4  ;;  %v969_v21 = vrot.slane %v968_v3, 2  ;;  %v987_v23 = vrot.slane %v986_v38, 2  ;;  %v952_v33 = vadd.f32 %v951_v19, %v950_v11 }
 0x2c9   :  { %v711_v25 = vpop.permute.xlu1 %710  ;;  %v939_v52 = vadd.f32 %v938_v47, %v937_v20  ;;  %v934_v20 = vadd.f32 %v933_v4, %v932_v61  ;;  %v970_v39 = vadd.f32 %v969_v21, %v968_v3  ;;  %v988_v31 = vadd.f32 %v987_v23, %v986_v38 }
 0x2ca   :  { %v851_v35 = vmul.f32 %v819_v5, %v711_v25  ;;  %v869_v5 = vadd.f32 %v868_v2, %v867_v17  ;;  %v888_v17 = vrot.slane %v887_v30, 1  ;;  %v905_v25 = vadd.f32 %v904_v12, %v903_v10 }
 0x2cb   :  { %v940_v43 = vrot.slane %v939_v52, 2  ;;  %v935_v47 = vrot.slane %v934_v20, 1  ;;  %v953_v44 = vrot.slane %v952_v33, 1 }
 0x2cc   :  { %v947_v48 = vadd.f32 %v945_v34, %v851_v35  ;;  %v870_v40 = vrot.slane %v869_v5, 1  ;;  %v923_v34 = vadd.f32 %v922_v32, %v921_v63  ;;  %v906_v2 = vrot.slane %v905_v25, 1 }
 0x2cd   :  { %v941_v41 = vadd.f32 %v940_v43, %v939_v52  ;;  %v989_v63 = vrot.slane %v988_v31, 1  ;;  %v936_v27 = vadd.f32 %v935_v47, %v934_v20 }
 0x2ce   :  { %v955_v37 = vsel %vm530_vm7, %v947_v48, 0.0  ;;  %v963_v15 = vmul.f32 %v2155_v36, %v947_v48  ;;  %v917_v36 = vrot.slane %v916_v51, 1  ;;  %v871_v8 = vadd.f32 %v870_v40, %v869_v5 }
 0x2cf   :  { %v956_v0 = vrot.slane %v955_v37, 4  ;;  %v889_v48 = vadd.f32 %v888_v17, %v887_v30  ;;  %v924_v59 = vrot.slane %v923_v34, 1  ;;  %v942_v11 = vrot.slane %v941_v41, 1 }
 0x2d0   :  { %v907_v52 = vadd.f32 %v906_v2, %v905_v25  ;;  %v954_v5 = vadd.f32 %v953_v44, %v952_v33 }
 0x2d1   :  { %v957_v7 = vadd.f32 %v956_v0, %v955_v37  ;;  %v718_v14 = vpop.permute.xlu1 %717  ;;  %v918_v37 = vadd.f32 %v917_v36, %v916_v51  ;;  %v1000_v3 = vsel %vm998_vm3, %v871_v8, %v889_v48  ;;  %v925_v30 = vadd.f32 %v924_v59, %v923_v34  ;;  %v2092_v51 = vld [vmem:[#allocation13] ss:$0 sm:$0xff]  ;;  %v2093_v36 = vld [vmem:[#allocation14] ss:$0 sm:$0xff]  ;;  %v2053_v48 = vld [vmem:[#allocation17] sm:$0xff] }
 0x2d2   :  { %v852_v18 = vmul.f32 %v3037_v9, %v718_v14  ;;  %v900_v9 = vadd.f32 %v899_v16, %v898_v62  ;;  %v971_v62 = vrot.slane %v970_v39, 1  ;;  %v943_v4 = vadd.f32 %v942_v11, %v941_v41 }
 0x2d3   :  { %v958_v24 = vrot.slane %v957_v7, 2 }
 0x2d4   :  { %v965_v22 = vadd.f32 %v963_v15, %v852_v18  ;;  %v1002_v10 = vsel %vm1001_vm4, %v999_v26, %v900_v9  ;;  %v972_v14 = vadd.f32 %v971_v62, %v970_v39  ;;  %v990_v15 = vadd.f32 %v989_v63, %v988_v31 }
 0x2d5   :  { %v959_v46 = vadd.f32 %v958_v24, %v957_v7  ;;  %v1005_v12 = vsel %vm3338_vm5, %v1002_v10, %v918_v37  ;;  %v1003_v26 = vsel %vm1001_vm4, %v1000_v3, %v907_v52 }
 0x2d6   :  { %v973_v29 = vsel %vm530_vm7, %v965_v22, 0.0  ;;  %v981_v49 = vmul.f32 %v2157_v42, %v965_v22  ;;  %v1008_v32 = vsel %vm3337_vm6, %v1005_v12, %v936_v27  ;;  %v1006_v21 = vsel %vm3338_vm5, %v1003_v26, %v925_v30  ;;  %v2095_v26 = vld [vmem:[#allocation19] ss:$0 sm:$0xff] }
 0x2d7   :  { %v974_v35 = vrot.slane %v973_v29, 4  ;;  %v1011_v22 = vsel %vm3336_vm14, %v1008_v32, %v954_v5  ;;  %v1009_v40 = vsel %vm3337_vm6, %v1006_v21, %v943_v4 }
 0x2d8   :  { %v983_v6 = vadd.f32 %v981_v49, %v853_v50  ;;  %v960_v50 = vrot.slane %v959_v46, 1  ;;  %v1014_v17 = vsel %vm3335_vm15, %v1011_v22, %v972_v14  ;;  %v1024_v49 = vmul.f32 %v2092_v51, %v2895_v54  ;;  %v2054_v54 = vld [vmem:[#allocation17 + $0x8] sm:$0xff] }
 0x2d9   :  { %v975_v28 = vadd.f32 %v974_v35, %v973_v29  ;;  %v1017_v20 = vsel %vm3334_vm1, %v1014_v17, %v990_v15  ;;  %v1023_v29 = vmul.f32 %v2092_v51, %v2893_v53  ;;  %1151 = vmatpush.bf16.msra.mxu3 %v2054_v54  ;;  %v1171_v51 = vld [vmem:[#allocation20] sm:$0x7] }
 0x2da   :  { %v991_v55 = vsel %vm530_vm7, %v983_v6, 0.0  ;;  %v961_v18 = vadd.f32 %v960_v50, %v959_v46  ;;  %v1172_v17 = vperm.slane %v1171_v51, 0 }
 0x2db   :  { %v976_v42 = vrot.slane %v975_v28, 2  ;;  %v992_v61 = vrot.slane %v991_v55, 4  ;;  %v1025_v33 = vadd.f32 %v1023_v29, %v1017_v20  ;;  %v1180_v29 = vperm.slane %v1171_v51, 2 }
 0x2dc   :  { %v1012_v24 = vsel %vm3336_vm14, %v1009_v40, %v961_v18  ;;  %v1175_v40 = vperm.slane %v1171_v51, 1 }
 0x2dd   :  { %v977_v0 = vadd.f32 %v976_v42, %v975_v28  ;;  %v993_v1 = vadd.f32 %v992_v61, %v991_v55  ;;  %1152 = vmatpush.bf16.msra.mxu3 %v2053_v48 }
 0x2df   :  { %v978_v38 = vrot.slane %v977_v0, 1  ;;  %v994_v7 = vrot.slane %v993_v1, 2 }
 0x2e1   :  { %v995_v16 = vadd.f32 %v994_v7, %v993_v1  ;;  %v979_v19 = vadd.f32 %v978_v38, %v977_v0  ;;  %v2094_v38 = vld [vmem:[#allocation16] ss:$0 sm:$0xff] }
 0x2e3   :  { %v996_v43 = vrot.slane %v995_v16, 1  ;;  %v1015_v25 = vsel %vm3335_vm15, %v1012_v24, %v979_v19  ;;  %v2057_v19 = vld [vmem:[%s3319_s17 + $0x10] sm:$0xff] }
 0x2e5   :  { %v997_v23 = vadd.f32 %v996_v43, %v995_v16  ;;  %v2058_v16 = vld [vmem:[%s3319_s17 + $0x18] sm:$0xff]  ;;  %v2056_v43 = vld [vmem:[%s3319_s17 + $0x8] sm:$0xff] }
 0x2e6   :  { %1275 = vmatpush.bf16.msrb.mxu0 %v2058_v16 }
 0x2e7   :  { %v1018_v9 = vsel %vm3334_vm1, %v1015_v25, %v997_v23 }
 0x2e8   :  { %v1026_v34 = vadd.f32 %v1024_v49, %v1018_v9  ;;  %v2055_v49 = vld [vmem:[%s3319_s17] sm:$0xff] }
 0x2ea   :  { %v1027_v35 = vpack.c.bf16 %v1026_v34, %v1025_v33  ;;  %1276 = vmatpush.bf16.msrb.mxu0 %v2057_v19 }
 0x2ec   :  { %1988 = vmatmul.msk.bf16.vlgmr.msra.gmra.mxu2 %vm530_vm7, %v1027_v35 }
 0x2ee   :  { %1277 = vmatpush.bf16.msrb.mxu0 %v2056_v43 }
 0x2f2   :  { %1278 = vmatpush.bf16.msrb.mxu0 %v2055_v49 }
 0x36f   :  { %v1076_v39 = vpop.f32.mrf.mxu2 }
 0x370   :  { %v1077_v41 = vadd.f32 %v2093_v36, %v1076_v39 }
 0x372   :  { %v1081_v6 = vmul.f32 %v1077_v41, %v1077_v41 }
 0x374   :  { %v1083_v8 = vsel %vm327_vm0, %v1081_v6, 0.0 }
 0x375   :  { %1084 = vadd.xlane.f32.xlu1 %v1083_v8 }
 0x377   :  { %v1078_v31 = vpop.f32.mrf.mxu2 }
 0x378   :  { %v1079_v46 = vadd.f32 %v2093_v36, %v1078_v31 }
 0x37a   :  { %v1082_v28 = vmul.f32 %v1079_v46, %v1079_v46 }
 0x37c   :  { %v1086_v53 = vsel %vm327_vm0, %v1082_v28, 0.0 }
 0x37d   :  { %1087 = vadd.xlane.f32.xlu2 %v1086_v53 }
 0x3e8   :  { %v1085_v47 = vpop.xlane.xlu1 %1084 }
 0x3e9   :  { %v1089_v2 = vmul.f32 %v1085_v47, %v2834_v13 }
 0x3eb   :  { %v1091_v55 = vadd.f32 1e-05, %v1089_v2 }
 0x3ed   :  { %2158 = vrsqrt.f32 %v1091_v55  ;;  %vm1099_vm1 = vweird.f32 %v1091_v55 }
 0x3f0   :  { %v1088_v44 = vpop.xlane.xlu2 %1087 }
 0x3f1   :  { %v1090_v59 = vmul.f32 %v1088_v44, %v2834_v13 }
 0x3f3   :  { %v2159_v42 = vpop.eup %2158  ;;  %v1092_v61 = vadd.f32 1e-05, %v1090_v59 }
 0x3f4   :  { %v1094_v10 = vmul.f32 %v2159_v42, %v1091_v55  ;;  %vm1100_vm2 = vweird.f32 %v2159_v42 }
 0x3f5   :  { %2160 = vrsqrt.f32 %v1092_v61  ;;  %vm1101_vm15 = vmor %vm1099_vm1, %vm1100_vm2  ;;  %vm1109_vm6 = vweird.f32 %v1092_v61 }
 0x3f6   :  { %v1095_v37 = vmul.f32 %v2159_v42, %v1094_v10 }
 0x3f8   :  { %v1096_v62 = vmul.f32 0.5, %v1095_v37 }
 0x3fa   :  { %v1097_v11 = vsub.f32 1.5, %v1096_v62 }
 0x3fb   :  { %v2161_v63 = vpop.eup %2160 }
 0x3fc   :  { %v1104_v50 = vmul.f32 %v2161_v63, %v1092_v61  ;;  %v1098_v0 = vmul.f32 %v2159_v42, %v1097_v11  ;;  %vm1110_vm14 = vweird.f32 %v2161_v63 }
 0x3fd   :  { %vm1111_vm5 = vmor %vm1109_vm6, %vm1110_vm14 }
 0x3fe   :  { %v1105_v1 = vmul.f32 %v2161_v63, %v1104_v50  ;;  %v1102_v3 = vsel %vm1101_vm15, %v2159_v42, %v1098_v0 }
 0x3ff   :  { %v1113_v30 = vmul.f32 %v1102_v3, %v1077_v41 }
 0x400   :  { %v1106_v27 = vmul.f32 0.5, %v1105_v1 }
 0x401   :  { %v1119_v4 = vmul.f32 %v2094_v38, %v1113_v30 }
 0x402   :  { %v1107_v52 = vsub.f32 1.5, %v1106_v27 }
 0x404   :  { %v1108_v5 = vmul.f32 %v2161_v63, %v1107_v52 }
 0x406   :  { %v1112_v7 = vsel %vm1111_vm5, %v2161_v63, %v1108_v5 }
 0x407   :  { %v1114_v14 = vmul.f32 %v1112_v7, %v1079_v46 }
 0x409   :  { %v1120_v12 = vmul.f32 %v2094_v38, %v1114_v14 }
 0x40b   :  { %v1121_v15 = vpack.c.bf16 %v1120_v12, %v1119_v4 }
 0x40d   :  { %1997 = vmatmul.msk.bf16.vlgmr.msra.gmra.mxu3 %vm327_vm0, %v1121_v15 }
 0x490   :  { %v1154_v18 = vpop.f32.mrf.mxu3 }
 0x491   :  { %v1155_v32 = vadd.f32 %v2095_v26, %v1154_v18 }
 0x493   :  { %v1159_v23 = vrot.slane %v1155_v32, 7  ;;  %v1165_v24 = vrot.slane %v1155_v32, 1  ;;  %v1176_v8 = vmul.f32 %v1175_v40, %v1155_v32  ;;  %v2097_v32 = vld [vmem:[#allocation23] ss:$0 sm:$0xff] }
 0x498   :  { %v1156_v21 = vpop.f32.mrf.mxu3 }
 0x499   :  { %v1157_v22 = vadd.f32 %v2095_v26, %v1156_v21 }
 0x49b   :  { %v1160_v20 = vrot.slane %v1157_v22, 7  ;;  %v1166_v25 = vrot.slane %v1157_v22, 1  ;;  %v1177_v28 = vmul.f32 %v1175_v40, %v1157_v22 }
 0x49d   :  { %v1161_v9 = vsel %vm413_vm12, %v1159_v23, %v1160_v20  ;;  %v1162_v33 = vsel %vm413_vm12, %v1160_v20, %v1159_v23  ;;  %v1167_v34 = vsel %vm424_vm13, %v1165_v24, %v1166_v25  ;;  %v1168_v35 = vsel %vm424_vm13, %v1166_v25, %v1165_v24 }
 0x49e   :  { %v1163_v36 = vsel %vm2858_vm8, 0.0, %v1162_v33  ;;  %v1164_v39 = vsel %vm2862_vm9, 0.0, %v1161_v9  ;;  %v1169_v41 = vsel %vm2866_vm10, 0.0, %v1167_v34  ;;  %v1170_v6 = vsel %vm2870_vm11, 0.0, %v1168_v35 }
 0x49f   :  { %v1173_v31 = vmul.f32 %v1172_v17, %v1163_v36  ;;  %v1174_v46 = vmul.f32 %v1172_v17, %v1164_v39  ;;  %v1181_v54 = vmul.f32 %v1180_v29, %v1169_v41  ;;  %v1182_v47 = vmul.f32 %v1180_v29, %v1170_v6 }
 0x4a1   :  { %v1178_v53 = vadd.f32 %v1176_v8, %v1173_v31  ;;  %v1179_v45 = vadd.f32 %v1177_v28, %v1174_v46 }
 0x4a3   :  { %v1183_v48 = vadd.f32 %v1181_v54, %v1178_v53  ;;  %v1184_v2 = vadd.f32 %v1182_v47, %v1179_v45  ;;  %v1313_v54 = vld [vmem:[#allocation25] sm:$0xff] }
 0x4a5   :  { %v1190_v57 = vadd.f32 %v2096_v56, %v1184_v2  ;;  %v1189_v55 = vadd.f32 %v2096_v56, %v1183_v48  ;;  %v1314_v48 = vmul.f32 1.442695, %v1313_v54 }
 0x4a7   :  { %v1999_v44 = vmul.f32 -1.442695, %v1190_v57  ;;  %v1998_v58 = vmul.f32 -1.442695, %v1189_v55 }
 0x4a9   :  { %2162 = vpow2.f32 %v1999_v44 }
 0x4aa   :  { %2164 = vpow2.f32 %v1998_v58 }
 0x4af   :  { %v2163_v60 = vpop.eup %2162 }
 0x4b0   :  { %v2165_v59 = vpop.eup %2164  ;;  %v1198_v42 = vadd.f32 1.0, %v2163_v60 }
 0x4b1   :  { %v1197_v61 = vadd.f32 1.0, %v2165_v59 }
 0x4b2   :  { %2166 = vrcp.f32 %v1198_v42  ;;  %v1225_v0 = vand.u32 2147483648, %v1198_v42  ;;  %v1223_v3 = vand.u32 2147483647, %v1198_v42  ;;  %vm1219_vm10 = vweird.f32 %v1198_v42 }
 0x4b3   :  { %2168 = vrcp.f32 %v1197_v61  ;;  %v1210_v1 = vand.u32 2147483648, %v1197_v61  ;;  %v1208_v5 = vand.u32 2147483647, %v1197_v61  ;;  %vm1204_vm11 = vweird.f32 %v1197_v61 }
 0x4b4   :  { %v1226_v7 = vor.u32 1.1754944e-38, %v1225_v0  ;;  %vm1224_vm5 = vcmp.eq.f32.partialorder %v1223_v3, 8.507059e+37 }
 0x4b5   :  { %v1211_v14 = vor.u32 1.1754944e-38, %v1210_v1  ;;  %vm1209_vm6 = vcmp.eq.f32.partialorder %v1208_v5, 8.507059e+37 }
 0x4b8   :  { %v2167_v10 = vpop.eup %2166 }
 0x4b9   :  { %v2169_v37 = vpop.eup %2168  ;;  %v1215_v62 = vmul.f32 %v2167_v10, %v1198_v42  ;;  %vm1220_vm8 = vweird.f32 %v2167_v10 }
 0x4ba   :  { %v1200_v11 = vmul.f32 %v2169_v37, %v1197_v61  ;;  %vm1205_vm9 = vweird.f32 %v2169_v37  ;;  %vm1221_vm12 = vmor %vm1219_vm10, %vm1220_vm8  ;;  %vm3372_vm8 = vcmask 1042432  }
 0x4bb   :  { %v1216_v63 = vsub.f32 1.0, %v1215_v62  ;;  %vm1206_vm13 = vmor %vm1204_vm11, %vm1205_vm9  ;;  %vm3373_vm9 = vcmask 1043456   ;;  %vm3375_vm11 = vcmask 1044480  }
 0x4bc   :  { %v1201_v50 = vsub.f32 1.0, %v1200_v11  ;;  %vm3374_vm10 = vmmov %vm3372_vm8 }
 0x4bd   :  { %v1217_v27 = vmul.f32 %v2167_v10, %v1216_v63 }
 0x4be   :  { %v1202_v52 = vmul.f32 %v2169_v37, %v1201_v50 }
 0x4bf   :  { %v1218_v30 = vadd.f32 %v2167_v10, %v1217_v27 }
 0x4c0   :  { %v1203_v38 = vadd.f32 %v2169_v37, %v1202_v52 }
 0x4c1   :  { %v1222_v4 = vsel %vm1221_vm12, %v2167_v10, %v1218_v30  ;;  %vm3376_vm12 = vmmov %vm3373_vm9 }
 0x4c2   :  { %v1207_v12 = vsel %vm1206_vm13, %v2169_v37, %v1203_v38  ;;  %v1227_v15 = vsel %vm1224_vm5, %v1226_v7, %v1222_v4  ;;  %vm3378_vm13 = vmmov %vm3375_vm11  ;;  %vm3379_vm5 = vcmask 1046528  }
 0x4c3   :  { %v1212_v18 = vsel %vm1209_vm6, %v1211_v14, %v1207_v12  ;;  %v3109_v16 = vmul.f32 %v1227_v15, %v1190_v57  ;;  %vm3381_vm6 = vmmov %vm3379_vm5 }
 0x4c4   :  { %v3111_v26 = vmul.f32 %v1212_v18, %v1189_v55 }
 0x4c6   :  { %v1231_v19 = vpack.c.bf16 %v3109_v16, %v3111_v26 }
 0x4c8   :  { %2016 = vmatmul.msk.bf16.vlgmr.msrb.gmra.mxu0 %vm530_vm7, %v1231_v19 }
 0x545   :  { %v1280_v51 = vpop.f32.mrf.mxu0 }
 0x546   :  { %v1281_v21 = vadd.f32 %v2097_v32, %v1280_v51 }
 0x548   :  { %v1372_v43 = vperm.slane %v1281_v21, 3  ;;  %v1351_v22 = vperm.slane %v1281_v21, 0  ;;  %v1358_v20 = vperm.slane %v1281_v21, 1  ;;  %v1386_v25 = vperm.slane %v1281_v21, 5 }
 0x549   :  { %v1400_v29 = vperm.slane %v1281_v21, 7  ;;  %v1365_v49 = vperm.slane %v1281_v21, 2  ;;  %v1379_v33 = vperm.slane %v1281_v21, 4  ;;  %v1393_v41 = vperm.slane %v1281_v21, 6 }
 0x54a   :  { %1377 = vperm.xlu1 %2085, %v1372_v43   ;;  %1356 = vperm.xlu0 %2087, %v1351_v22   ;;  %v1287_v6 = vmin.f32 %v1281_v21, 20.0  ;;  %vm1285_vm15 = vcmp.gt.f32.partialorder %v1281_v21, 20.0 }
 0x54c   :  { %v1289_v31 = vmul.f32 1.442695, %v1287_v6 }
 0x54d   :  { %v1282_v40 = vpop.f32.mrf.mxu0 }
 0x54e   :  { %v3116_v17 = vadd.f32 %v2097_v32, %v1282_v40  ;;  %2170 = vpow2.f32 %v1289_v31 }
 0x550   :  { %v1421_v23 = vperm.slane %v3116_v17, 2  ;;  %v1442_v24 = vperm.slane %v3116_v17, 5  ;;  %v1449_v9 = vperm.slane %v3116_v17, 6  ;;  %v1407_v34 = vperm.slane %v3116_v17, 0 }
 0x551   :  { %v1414_v35 = vperm.slane %v3116_v17, 1  ;;  %v1428_v36 = vperm.slane %v3116_v17, 3  ;;  %v1435_v39 = vperm.slane %v3116_v17, 4  ;;  %v1456_v8 = vperm.slane %v3116_v17, 7 }
 0x552   :  { %1426 = vperm.xlu2 %2086, %v1421_v23   ;;  %1447 = vperm.xlu1 %2085, %v1442_v24   ;;  %v1288_v53 = vmin.f32 %v3116_v17, 20.0  ;;  %vm1286_vm2 = vcmp.gt.f32.partialorder %v3116_v17, 20.0 }
 0x553   :  { %1363 = vperm.xlu0 %2087, %v1358_v20  }
 0x554   :  { %v2171_v46 = vpop.eup %2170  ;;  %v1291_v47 = vmul.f32 1.442695, %v1288_v53 }
 0x555   :  { %v1293_v28 = vadd.f32 1.0, %v2171_v46  ;;  %v1296_v45 = vmul.f32 -0.5, %v2171_v46  ;;  %v1299_v57 = vand.u32 2147483647, %v2171_v46 }
 0x557   :  { %2172 = vlog2.f32 %v1293_v28  ;;  %v1297_v2 = vadd.f32 1.0, %v1296_v45  ;;  %vm1300_vm14 = vcmp.lt.f32.partialorder %v1299_v57, 0.0004427343 }
 0x558   :  { %2174 = vpow2.f32 %v1291_v47 }
 0x559   :  { %2176 = vpow2.f32 %v1314_v48  ;;  %v1298_v44 = vmul.f32 %v2171_v46, %v1297_v2 }
 0x55a   :  { %1391 = vperm.xlu2 %2086, %v1386_v25   ;;  %1405 = vperm.xlu1 %2085, %v1400_v29  }
 0x55b   :  { %1370 = vperm.xlu0 %2087, %v1365_v49  }
 0x55d   :  { %v2173_v56 = vpop.eup %2172 }
 0x55e   :  { %v1295_v55 = vmul.f32 0.6931472, %v2173_v56  ;;  %v2175_v60 = vpop.eup %2174 }
 0x55f   :  { %v2177_v59 = vpop.eup %2176  ;;  %v1302_v61 = vadd.f32 1.0, %v2175_v60  ;;  %v1305_v63 = vmul.f32 -0.5, %v2175_v60  ;;  %v1308_v52 = vand.u32 2147483647, %v2175_v60 }
 0x560   :  { %v1301_v58 = vsel %vm1300_vm14, %v1298_v44, %v1295_v55  ;;  %v3129_v10 = vsub.f32 0.0, %v2177_v59 }
 0x561   :  { %v3127_v42 = vsel %vm1285_vm15, %v1281_v21, %v1301_v58  ;;  %2178 = vlog2.f32 %v1302_v61  ;;  %v1306_v3 = vadd.f32 1.0, %v1305_v63  ;;  %vm1309_vm1 = vcmp.lt.f32.partialorder %v1308_v52, 0.0004427343 }
 0x562   :  { %1454 = vperm.xlu2 %2086, %v1449_v9   ;;  %v1463_v37 = vperm.slane %v3127_v42, 0  ;;  %v1319_v11 = vrot.slane %v3127_v42, 1  ;;  %v1320_v5 = vrot.slane %v3127_v42, 2  ;;  %v3138_v14 = vmul.f32 %v3127_v42, %v3111_v26 }
 0x563   :  { %1384 = vperm.xlu0 %2087, %v1379_v33   ;;  %v1307_v7 = vmul.f32 %v2175_v60, %v1306_v3  ;;  %v1321_v19 = vrot.slane %v3127_v42, 3  ;;  %v1323_v2 = vrot.slane %v3127_v42, 5 }
 0x564   :  { %v1495_v62 = vmul.f32 %v1463_v37, %v3129_v10  ;;  %v1464_v27 = vperm.slane %v1319_v11, 0  ;;  %v1465_v4 = vperm.slane %v1320_v5, 0  ;;  %v1543_v32 = vperm.slane %v3138_v14, 0 }
 0x565   :  { %v1337_v40 = vrot.slane %v3138_v14, 1  ;;  %v1466_v23 = vperm.slane %v1321_v19, 0  ;;  %v1338_v33 = vrot.slane %v3138_v14, 2  ;;  %v1341_v61 = vrot.slane %v3138_v14, 5 }
 0x566   :  { %v1511_v1 = vmul.f32 1.442695, %v1495_v62  ;;  %v1496_v38 = vmul.f32 %v1464_v27, %v3129_v10  ;;  %v1497_v43 = vmul.f32 %v1465_v4, %v3129_v10  ;;  %v1339_v37 = vrot.slane %v3138_v14, 3 }
 0x567   :  { %v2179_v0 = vpop.eup %2178  ;;  %v1544_v49 = vperm.slane %v1337_v40, 0  ;;  %v1545_v31 = vperm.slane %v1338_v33, 0  ;;  %v1343_v62 = vrot.slane %v3138_v14, 7  ;;  %v1468_v63 = vperm.slane %v1323_v2, 0 }
 0x568   :  { %v1304_v30 = vmul.f32 0.6931472, %v2179_v0  ;;  %2180 = vpow2.f32 %v1511_v1  ;;  %v1513_v18 = vmul.f32 1.442695, %v1496_v38  ;;  %v1515_v25 = vmul.f32 1.442695, %v1497_v43 }
 0x569   :  { %v3172_v52 = vperm.slane %v1341_v61, 0  ;;  %v1324_v38 = vrot.slane %v3127_v42, 6  ;;  %v1546_v4 = vperm.slane %v1339_v37, 0 }
 0x56a   :  { %v1310_v12 = vsel %vm1309_vm1, %v1307_v7, %v1304_v30  ;;  %2182 = vpow2.f32 %v1513_v18  ;;  %v1340_v18 = vrot.slane %v3138_v14, 4 }
 0x56b   :  { %1412 = vperm.xlu0 %2087, %v1407_v34   ;;  %v3144_v21 = vsel %vm1286_vm2, %v3116_v17, %v1310_v12  ;;  %v1498_v17 = vmul.f32 %v1466_v23, %v3129_v10  ;;  %v1322_v34 = vrot.slane %v3127_v42, 4  ;;  %2184 = vpow2.f32 %v1515_v25 }
 0x56c   :  { %v1471_v20 = vperm.slane %v3144_v21, 0  ;;  %v1327_v45 = vrot.slane %v3144_v21, 2  ;;  %v1328_v55 = vrot.slane %v3144_v21, 3  ;;  %v3164_v59 = vmul.f32 %v3144_v21, %v3109_v16 }
 0x56d   :  { %v1467_v46 = vperm.slane %v1322_v34, 0  ;;  %v3176_v12 = vperm.slane %v1343_v62, 0  ;;  %v1329_v43 = vrot.slane %v3144_v21, 4  ;;  %v1547_v34 = vperm.slane %v1340_v18, 0 }
 0x56e   :  { %v2181_v51 = vpop.eup %2180  ;;  %v1473_v58 = vperm.slane %v1327_v45, 0  ;;  %v1474_v27 = vperm.slane %v1328_v55, 0  ;;  %v1551_v30 = vperm.slane %v3164_v59, 0  ;;  %v1345_v33 = vrot.slane %v3164_v59, 2 }
 0x56f   :  { %v1591_v24 = vmul.f32 0.0, %v2181_v51  ;;  %v1499_v57 = vmul.f32 %v1467_v46, %v3129_v10  ;;  %v1346_v45 = vrot.slane %v3164_v59, 3 }
 0x570   :  { %v1505_v0 = vmul.f32 %v1473_v58, %v3129_v10  ;;  %v1506_v23 = vmul.f32 %v1474_v27, %v3129_v10  ;;  %v1348_v27 = vrot.slane %v3164_v59, 5 }
 0x572   :  { %v1531_v40 = vmul.f32 1.442695, %v1505_v0  ;;  %v1533_v46 = vmul.f32 1.442695, %v1506_v23 }
 0x573   :  { %1419 = vperm.xlu0 %2087, %v1414_v35  }
 0x57b   :  { %1433 = vperm.xlu0 %2087, %v1428_v36   ;;  %v1503_v36 = vmul.f32 %v1471_v20, %v3129_v10 }
 0x57d   :  { %v1527_v53 = vmul.f32 1.442695, %v1503_v36 }
 0x583   :  { %1440 = vperm.xlu0 %2087, %v1435_v39   ;;  %v1326_v39 = vrot.slane %v3144_v21, 1 }
 0x585   :  { %v1472_v54 = vperm.slane %v1326_v39, 0 }
 0x587   :  { %v1504_v60 = vmul.f32 %v1472_v54, %v3129_v10 }
 0x589   :  { %v1529_v1 = vmul.f32 1.442695, %v1504_v60 }
 0x58b   :  { %1398 = vperm.xlu0 %2087, %v1393_v41   ;;  %v2183_v41 = vpop.eup %2182 }
 0x58c   :  { %v2185_v48 = vpop.eup %2184 }
 0x593   :  { %1461 = vperm.xlu0 %2087, %v1456_v8   ;;  %v1517_v8 = vmul.f32 1.442695, %v1498_v17  ;;  %v1349_v17 = vrot.slane %v3164_v59, 6 }
 0x595   :  { %2186 = vpow2.f32 %v1517_v8 }
 0x596   :  { %2188 = vpow2.f32 %v1527_v53 }
 0x59b   :  { %v2187_v3 = vpop.eup %2186 }
 0x59c   :  { %v2189_v7 = vpop.eup %2188 }
 0x59d   :  { %v1592_v25 = vmul.f32 0.0, %v2189_v7 }
 0x5bc   :  { %v1357_v50 = vpop.permute.xlu0 %1356  ;;  %v1378_v5 = vpop.permute.xlu1 %1377 }
 0x5bd   :  { %v1575_v22 = vmul.f32 %v1543_v32, %v1357_v50  ;;  %v1519_v50 = vmul.f32 1.442695, %v1499_v57  ;;  %v1500_v32 = vmul.f32 %v1468_v63, %v3129_v10  ;;  %v1553_v63 = vperm.slane %v1345_v33, 0 }
 0x5bf   :  { %v3149_v29 = vadd.f32 %v1591_v24, %v1575_v22  ;;  %2190 = vpow2.f32 %v1519_v50  ;;  %v1578_v22 = vmul.f32 %v1546_v4, %v1378_v5  ;;  %v1427_v24 = vpop.permute.xlu2 %1426  ;;  %v1521_v36 = vmul.f32 1.442695, %v1500_v32 }
 0x5c0   :  { %2192 = vpow2.f32 %v1529_v1 }
 0x5c1   :  { %v1609_v6 = vmul.f32 %v2183_v41, %v3149_v29  ;;  %v1475_v41 = vperm.slane %v1329_v43, 0  ;;  %v1595_v8 = vsel %vm530_vm7, %v3149_v29, 0.0  ;;  %2194 = vpow2.f32 %v1531_v40 }
 0x5c2   :  { %v1596_v58 = vrot.slane %v1595_v8, 4  ;;  %2196 = vpow2.f32 %v1521_v36  ;;  %v1347_v40 = vrot.slane %v3164_v59, 4 }
 0x5c3   :  { %2198 = vpow2.f32 %v1533_v46  ;;  %v1507_v37 = vmul.f32 %v1475_v41, %v3129_v10 }
 0x5c4   :  { %v1597_v7 = vadd.f32 %v1596_v58, %v1595_v8  ;;  %v1448_v36 = vpop.permute.xlu1 %1447 }
 0x5c5   :  { %v1364_v15 = vpop.permute.xlu0 %1363  ;;  %v1535_v32 = vmul.f32 1.442695, %v1507_v37 }
 0x5c6   :  { %v1576_v35 = vmul.f32 %v1544_v49, %v1364_v15  ;;  %v1344_v49 = vrot.slane %v3164_v59, 1 }
 0x5c7   :  { %2200 = vpow2.f32 %v1535_v32 }
 0x5c8   :  { %v1611_v28 = vadd.f32 %v1609_v6, %v1576_v35  ;;  %v1325_v6 = vrot.slane %v3127_v42, 7  ;;  %v1552_v53 = vperm.slane %v1344_v49, 0  ;;  %v1332_v42 = vrot.slane %v3144_v21, 7 }
 0x5ca   :  { %v1627_v44 = vmul.f32 %v2185_v48, %v1611_v28  ;;  %v1613_v20 = vsel %vm530_vm7, %v1611_v28, 0.0  ;;  %v2191_v28 = vpop.eup %2190  ;;  %v1470_v62 = vperm.slane %v1325_v6, 0  ;;  %v1478_v5 = vperm.slane %v1332_v42, 0 }
 0x5cb   :  { %v2193_v48 = vpop.eup %2192  ;;  %v1555_v42 = vperm.slane %v1347_v40, 0 }
 0x5cc   :  { %v2195_v1 = vpop.eup %2194 }
 0x5cd   :  { %v1371_v9 = vpop.permute.xlu0 %1370  ;;  %v2197_v43 = vpop.eup %2196 }
 0x5ce   :  { %v1577_v47 = vmul.f32 %v1545_v31, %v1371_v9  ;;  %v1330_v9 = vrot.slane %v3144_v21, 5  ;;  %v1614_v31 = vrot.slane %v1613_v20, 4 }
 0x5d0   :  { %v3169_v11 = vadd.f32 %v1627_v44, %v1577_v47  ;;  %v1476_v54 = vperm.slane %v1330_v9, 0  ;;  %v1331_v47 = vrot.slane %v3144_v21, 6  ;;  %v1469_v44 = vperm.slane %v1324_v38, 0  ;;  %v1392_v38 = vpop.permute.xlu2 %1391 }
 0x5d1   :  { %v1615_v61 = vadd.f32 %v1614_v31, %v1613_v20  ;;  %v1580_v31 = vmul.f32 %v3172_v52, %v1392_v38  ;;  %v1556_v52 = vperm.slane %v1348_v27, 0 }
 0x5d2   :  { %v1645_v15 = vmul.f32 %v2187_v3, %v3169_v11  ;;  %v1477_v0 = vperm.slane %v1331_v47, 0  ;;  %v1501_v3 = vmul.f32 %v1469_v44, %v3129_v10  ;;  %v1631_v4 = vsel %vm530_vm7, %v3169_v11, 0.0 }
 0x5d3   :  { %v1616_v18 = vrot.slane %v1615_v61, 2  ;;  %v1510_v11 = vmul.f32 %v1478_v5, %v3129_v10 }
 0x5d4   :  { %v1647_v35 = vadd.f32 %v1645_v15, %v1578_v22  ;;  %v1509_v20 = vmul.f32 %v1477_v0, %v3129_v10  ;;  %v1523_v33 = vmul.f32 1.442695, %v1501_v3 }
 0x5d5   :  { %v1385_v56 = vpop.permute.xlu0 %1384  ;;  %v1617_v46 = vadd.f32 %v1616_v18, %v1615_v61 }
 0x5d6   :  { %v1579_v2 = vmul.f32 %v1547_v34, %v1385_v56  ;;  %v1663_v57 = vmul.f32 %v2191_v28, %v1647_v35  ;;  %v1508_v56 = vmul.f32 %v1476_v54, %v3129_v10  ;;  %v1598_v34 = vrot.slane %v1597_v7, 2 }
 0x5d7   :  { %v1649_v41 = vsel %vm530_vm7, %v1647_v35, 0.0  ;;  %v1539_v54 = vmul.f32 1.442695, %v1509_v20  ;;  %v1557_v35 = vperm.slane %v1349_v17, 0  ;;  %v1618_v44 = vrot.slane %v1617_v46, 1  ;;  %v2062_v17 = vld [vmem:[%s3323_s21 + $0x18] sm:$0xff] }
 0x5d8   :  { %v1665_v21 = vadd.f32 %v1663_v57, %v1579_v2  ;;  %v1537_v23 = vmul.f32 1.442695, %v1508_v56  ;;  %v1541_v2 = vmul.f32 1.442695, %v1510_v11  ;;  %v1599_v57 = vadd.f32 %v1598_v34, %v1597_v7  ;;  %v1455_v58 = vpop.permute.xlu2 %1454  ;;  %1801 = vmatpush.bf16.msrb.mxu3 %v2062_v17  ;;  %v2061_v7 = vld [vmem:[%s3323_s21 + $0x10] sm:$0xff] }
 0x5d9   :  { %v1589_v3 = vmul.f32 %v1557_v35, %v1455_v58  ;;  %v1619_v5 = vadd.f32 %v1618_v44, %v1617_v46 }
 0x5da   :  { %v1681_v49 = vmul.f32 %v2197_v43, %v1665_v21  ;;  %2202 = vpow2.f32 %v1537_v23  ;;  %v1600_v0 = vrot.slane %v1599_v57, 1  ;;  %v1588_v43 = vmul.f32 %v1556_v52, %v1448_v36  ;;  %v2060_v36 = vld [vmem:[%s3323_s21 + $0x8] sm:$0xff] }
 0x5db   :  { %2204 = vpow2.f32 %v1523_v33 }
 0x5dc   :  { %1802 = vmatpush.bf16.msrb.mxu3 %v2061_v7 }
 0x5dd   :  { %v1413_v19 = vpop.permute.xlu0 %1412 }
 0x5de   :  { %v1583_v51 = vmul.f32 %v1551_v30, %v1413_v19  ;;  %v1585_v30 = vmul.f32 %v1553_v63, %v1427_v24  ;;  %v1554_v19 = vperm.slane %v1346_v45, 0  ;;  %v2199_v24 = vpop.eup %2198  ;;  %v1350_v45 = vrot.slane %v3164_v59, 7 }
 0x5df   :  { %v2201_v61 = vpop.eup %2200 }
 0x5e0   :  { %v3188_v39 = vadd.f32 %v1592_v25, %v1583_v51  ;;  %v1502_v51 = vmul.f32 %v1470_v62, %v3129_v10  ;;  %v1632_v25 = vrot.slane %v1631_v4, 4  ;;  %v3214_v10 = vadd.f32 %v1681_v49, %v1580_v31  ;;  %v2203_v56 = vpop.eup %2202  ;;  %1803 = vmatpush.bf16.msrb.mxu3 %v2060_v36 }
 0x5e2   :  { %v1610_v29 = vmul.f32 %v2193_v48, %v3188_v39  ;;  %v1525_v28 = vmul.f32 1.442695, %v1502_v51  ;;  %v1633_v47 = vadd.f32 %v1632_v25, %v1631_v4  ;;  %v1650_v48 = vrot.slane %v1649_v41, 4  ;;  %v2205_v4 = vpop.eup %2204 }
 0x5e3   :  { %v1685_v59 = vsel %vm530_vm7, %v3214_v10, 0.0  ;;  %v1602_v18 = vsel %vm530_vm7, %v3188_v39, 0.0 }
 0x5e4   :  { %2206 = vpow2.f32 %v1525_v28  ;;  %v1634_v37 = vrot.slane %v1633_v47, 2  ;;  %v1651_v62 = vadd.f32 %v1650_v48, %v1649_v41  ;;  %v1686_v32 = vrot.slane %v1685_v59, 4 }
 0x5e5   :  { %v1420_v55 = vpop.permute.xlu0 %1419  ;;  %2208 = vpow2.f32 %v1539_v54  ;;  %v1603_v39 = vrot.slane %v1602_v18, 4 }
 0x5e6   :  { %v1584_v60 = vmul.f32 %v1552_v53, %v1420_v55  ;;  %v1342_v53 = vrot.slane %v3138_v14, 6  ;;  %v1667_v14 = vsel %vm530_vm7, %v1665_v21, 0.0  ;;  %2210 = vpow2.f32 %v1541_v2 }
 0x5e7   :  { %v1635_v40 = vadd.f32 %v1634_v37, %v1633_v47  ;;  %v1652_v23 = vrot.slane %v1651_v62, 2  ;;  %v1687_v46 = vadd.f32 %v1686_v32, %v1685_v59 }
 0x5e8   :  { %v3198_v50 = vadd.f32 %v1610_v29, %v1584_v60  ;;  %v1549_v29 = vperm.slane %v1342_v53, 0  ;;  %v3219_v60 = vperm.slane %v1350_v45, 0 }
 0x5e9   :  { %v1636_v28 = vrot.slane %v1635_v40, 1  ;;  %v3243_v53 = vadd.f32 %v1652_v23, %v1651_v62 }
 0x5ea   :  { %v1628_v15 = vmul.f32 %v2195_v1, %v3198_v50  ;;  %v1620_v1 = vsel %vm530_vm7, %v3198_v50, 0.0  ;;  %v2207_v51 = vpop.eup %2206 }
 0x5eb   :  { %v1621_v20 = vrot.slane %v1620_v1, 4  ;;  %v1637_v62 = vadd.f32 %v1636_v28, %v1635_v40 }
 0x5ec   :  { %v1630_v22 = vadd.f32 %v1628_v15, %v1585_v30  ;;  %v1668_v30 = vrot.slane %v1667_v14, 4  ;;  %v1406_v15 = vpop.permute.xlu1 %1405 }
 0x5ed   :  { %v1434_v9 = vpop.permute.xlu0 %1433  ;;  %v1582_v11 = vmul.f32 %v3176_v12, %v1406_v15  ;;  %v1622_v45 = vadd.f32 %v1621_v20, %v1620_v1  ;;  %v1699_v12 = vmul.f32 %v2205_v4, %v3214_v10  ;;  %v1654_v10 = vrot.slane %v3243_v53, 1 }
 0x5ee   :  { %v1646_v6 = vmul.f32 %v2199_v24, %v1630_v22  ;;  %v1586_v8 = vmul.f32 %v1554_v19, %v1434_v9  ;;  %v1638_v38 = vsel %vm530_vm7, %v1630_v22, 0.0  ;;  %v2209_v22 = vpop.eup %2208  ;;  %v1601_v24 = vadd.f32 %v1600_v0, %v1599_v57 }
 0x5ef   :  { %v1639_v25 = vrot.slane %v1638_v38, 4  ;;  %v2211_v33 = vpop.eup %2210  ;;  %v1669_v34 = vadd.f32 %v1668_v30, %v1667_v14  ;;  %v1688_v14 = vrot.slane %v1687_v46, 2 }
 0x5f0   :  { %v1648_v55 = vadd.f32 %v1646_v6, %v1586_v8  ;;  %v3241_v6 = vsel %vm998_vm3, %v1601_v24, %v1619_v5 }
 0x5f1   :  { %v1640_v47 = vadd.f32 %v1639_v25, %v1638_v38  ;;  %v1670_v57 = vrot.slane %v1669_v34, 2  ;;  %v1689_v7 = vadd.f32 %v1688_v14, %v1687_v46 }
 0x5f2   :  { %v1664_v27 = vmul.f32 %v2201_v61, %v1648_v55  ;;  %v1656_v19 = vsel %vm530_vm7, %v1648_v55, 0.0  ;;  %v1604_v55 = vadd.f32 %v1603_v39, %v1602_v18 }
 0x5f3   :  { %v1657_v41 = vrot.slane %v1656_v19, 4  ;;  %v1671_v30 = vadd.f32 %v1670_v57, %v1669_v34 }
 0x5f4   :  { %v1605_v1 = vrot.slane %v1604_v55, 2 }
 0x5f5   :  { %v1441_v63 = vpop.permute.xlu0 %1440  ;;  %v1658_v52 = vadd.f32 %v1657_v41, %v1656_v19  ;;  %v1672_v25 = vrot.slane %v1671_v30, 1 }
 0x5f6   :  { %v1587_v21 = vmul.f32 %v1555_v42, %v1441_v63  ;;  %v2059_v42 = vld [vmem:[%s3323_s21] sm:$0xff]  ;;  %v1623_v63 = vrot.slane %v1622_v45, 2  ;;  %v1606_v23 = vadd.f32 %v1605_v1, %v1604_v55 }
 0x5f7   :  { %1804 = vmatpush.bf16.msrb.mxu3 %v2059_v42 }
 0x5f8   :  { %v1666_v50 = vadd.f32 %v1664_v27, %v1587_v21  ;;  %v1659_v27 = vrot.slane %v1658_v52, 2  ;;  %v1624_v4 = vadd.f32 %v1623_v63, %v1622_v45 }
 0x5fa   :  { %v1674_v49 = vsel %vm530_vm7, %v1666_v50, 0.0  ;;  %v1682_v9 = vmul.f32 %v2203_v56, %v1666_v50  ;;  %v1660_v20 = vadd.f32 %v1659_v27, %v1658_v52 }
 0x5fb   :  { %v1675_v8 = vrot.slane %v1674_v49, 4 }
 0x5fc   :  { %v1684_v31 = vadd.f32 %v1682_v9, %v1588_v43  ;;  %v1661_v45 = vrot.slane %v1660_v20, 1 }
 0x5fd   :  { %v1399_v54 = vpop.permute.xlu0 %1398  ;;  %v1676_v58 = vadd.f32 %v1675_v8, %v1674_v49 }
 0x5fe   :  { %v1692_v48 = vsel %vm530_vm7, %v1684_v31, 0.0  ;;  %v1581_v2 = vmul.f32 %v1549_v29, %v1399_v54  ;;  %v1700_v35 = vmul.f32 %v2209_v22, %v1684_v31  ;;  %v1641_v29 = vrot.slane %v1640_v47, 2 }
 0x5ff   :  { %v1693_v44 = vrot.slane %v1692_v48, 4  ;;  %v1677_v38 = vrot.slane %v1676_v58, 2  ;;  %v1690_v31 = vrot.slane %v1689_v7, 1 }
 0x600   :  { %v1701_v61 = vadd.f32 %v1699_v12, %v1581_v2  ;;  %v1702_v37 = vadd.f32 %v1700_v35, %v1589_v3  ;;  %v1642_v32 = vadd.f32 %v1641_v29, %v1640_v47  ;;  %v1737_v12 = vsel %vm1001_vm4, %v3241_v6, %v1637_v62 }
 0x601   :  { %v1694_v59 = vadd.f32 %v1693_v44, %v1692_v48  ;;  %v1678_v49 = vadd.f32 %v1677_v38, %v1676_v58  ;;  %v1655_v47 = vadd.f32 %v1654_v10, %v3243_v53  ;;  %v1673_v44 = vadd.f32 %v1672_v25, %v1671_v30 }
 0x602   :  { %v1703_v17 = vsel %vm530_vm7, %v1701_v61, 0.0  ;;  %v1717_v56 = vmul.f32 %v2207_v51, %v1701_v61  ;;  %v1710_v0 = vsel %vm530_vm7, %v1702_v37, 0.0  ;;  %v1718_v51 = vmul.f32 %v2211_v33, %v1702_v37 }
 0x603   :  { %v1704_v21 = vrot.slane %v1703_v17, 4  ;;  %v1711_v5 = vrot.slane %v1710_v0, 4  ;;  %v1695_v15 = vrot.slane %v1694_v59, 2  ;;  %v1643_v8 = vrot.slane %v1642_v32, 1 }
 0x604   :  { %v1719_v3 = vadd.f32 %v1717_v56, %v1582_v11  ;;  %v1625_v11 = vrot.slane %v1624_v4, 1  ;;  %v1607_v33 = vrot.slane %v1606_v23, 1  ;;  %v1679_v48 = vrot.slane %v1678_v49, 1 }
 0x605   :  { %v1705_v18 = vadd.f32 %v1704_v21, %v1703_v17  ;;  %v1712_v19 = vadd.f32 %v1711_v5, %v1710_v0  ;;  %v1462_v50 = vpop.permute.xlu0 %1461  ;;  %v1696_v39 = vadd.f32 %v1695_v15, %v1694_v59  ;;  %v1644_v42 = vadd.f32 %v1643_v8, %v1642_v32  ;;  %v2098_v21 = vld [vmem:[%s3322_s20] ss:$0 sm:$0xff] }
 0x606   :  { %v1721_v43 = vsel %vm530_vm7, %v1719_v3, 0.0  ;;  %v1590_v40 = vmul.f32 %v3219_v60, %v1462_v50  ;;  %v1626_v35 = vadd.f32 %v1625_v11, %v1624_v4  ;;  %v1691_v58 = vadd.f32 %v1690_v31, %v1689_v7  ;;  %v2064_v31 = vld [vmem:[%s3326_s24 + $0x8] sm:$0xff] }
 0x607   :  { %v1706_v22 = vrot.slane %v1705_v18, 2  ;;  %v1722_v24 = vrot.slane %v1721_v43, 4  ;;  %v1713_v9 = vrot.slane %v1712_v19, 2  ;;  %v1697_v57 = vrot.slane %v1696_v39, 1  ;;  %1912 = vmatpush.bf16.msrb.mxu1 %v2064_v31 }
 0x608   :  { %v1720_v34 = vadd.f32 %v1718_v51, %v1590_v40  ;;  %v1608_v61 = vadd.f32 %v1607_v33, %v1606_v23  ;;  %v1662_v37 = vadd.f32 %v1661_v45, %v1660_v20  ;;  %v1739_v29 = vsel %vm3372_vm8, %v1737_v12, %v1655_v47  ;;  %v2099_v20 = vld [vmem:[%s3324_s22] ss:$0 sm:$0xff] }
 0x609   :  { %v1707_v41 = vadd.f32 %v1706_v22, %v1705_v18  ;;  %v1723_v36 = vadd.f32 %v1722_v24, %v1721_v43  ;;  %v1714_v46 = vadd.f32 %v1713_v9, %v1712_v19  ;;  %v1680_v17 = vadd.f32 %v1679_v48, %v1678_v49  ;;  %v2063_v45 = vld [vmem:[%s3326_s24] sm:$0xff] }
 0x60a   :  { %v1728_v28 = vsel %vm530_vm7, %v1720_v34, 0.0  ;;  %v1736_v53 = vsel %vm998_vm3, %v1608_v61, %v1626_v35  ;;  %v1698_v62 = vadd.f32 %v1697_v57, %v1696_v39  ;;  %v1741_v0 = vsel %vm3373_vm9, %v1739_v29, %v1673_v44  ;;  %v2100_v35 = vld [vmem:[%s3325_s23] ss:$0 sm:$0xff] }
 0x60b   :  { %v1724_v60 = vrot.slane %v1723_v36, 2  ;;  %v1729_v54 = vrot.slane %v1728_v28, 4  ;;  %v1708_v2 = vrot.slane %v1707_v41, 1  ;;  %v1715_v14 = vrot.slane %v1714_v46, 1  ;;  %1913 = vmatpush.bf16.msrb.mxu1 %v2063_v45 }
 0x60c   :  { %v1738_v1 = vsel %vm1001_vm4, %v1736_v53, %v1644_v42  ;;  %v1743_v38 = vsel %vm3375_vm11, %v1741_v0, %v1691_v58  ;;  %vm3377_vm3 = vcmask 1045504   ;;  %v1753_v50 = vmul.f32 %v2098_v21, %v3111_v26 }
 0x60d   :  { %v1725_v55 = vadd.f32 %v1724_v60, %v1723_v36  ;;  %v1730_v52 = vadd.f32 %v1729_v54, %v1728_v28  ;;  %v1709_v6 = vadd.f32 %v1708_v2, %v1707_v41  ;;  %v1716_v27 = vadd.f32 %v1715_v14, %v1714_v46  ;;  %vm3380_vm4 = vmmov %vm3377_vm3 }
 0x60e   :  { %v1740_v5 = vsel %vm3374_vm10, %v1738_v1, %v1662_v37  ;;  %v1754_v32 = vmul.f32 %v2098_v21, %v3109_v16  ;;  %v2638_v12 = vmov 8.0   ;;  %vm1888_vm10 = vcmask 1041409  }
 0x60f   :  { %v1726_v63 = vrot.slane %v1725_v55, 1  ;;  %v1731_v59 = vrot.slane %v1730_v52, 2  ;;  %v1742_v7 = vsel %vm3376_vm12, %v1740_v5, %v1680_v17  ;;  %v1745_v3 = vsel %vm3377_vm3, %v1743_v38, %v1709_v6 }
 0x610   :  { %v1744_v15 = vsel %vm3378_vm13, %v1742_v7, %v1698_v62 }
 0x611   :  { %v1727_v10 = vadd.f32 %v1726_v63, %v1725_v55  ;;  %v1732_v56 = vadd.f32 %v1731_v59, %v1730_v52  ;;  %v1746_v19 = vsel %vm3380_vm4, %v1744_v15, %v1716_v27 }
 0x613   :  { %v1733_v30 = vrot.slane %v1732_v56, 1  ;;  %v1747_v18 = vsel %vm3379_vm5, %v1745_v3, %v1727_v10 }
 0x614   :  { %v1755_v51 = vadd.f32 %v1753_v50, %v1747_v18 }
 0x615   :  { %v1734_v4 = vadd.f32 %v1733_v30, %v1732_v56 }
 0x617   :  { %v1748_v43 = vsel %vm3381_vm6, %v1746_v19, %v1734_v4 }
 0x618   :  { %v1756_v40 = vadd.f32 %v1754_v32, %v1748_v43 }
 0x61a   :  { %v1757_v23 = vpack.c.bf16 %v1756_v40, %v1755_v51 }
 0x61c   :  { %2033 = vmatmul.msk.bf16.vlgmr.msrb.gmra.mxu3 %vm530_vm7, %v1757_v23 }
 0x69f   :  { %v1806_v22 = vpop.f32.mrf.mxu3 }
 0x6a0   :  { %v1807_v24 = vadd.f32 %v2099_v20, %v1806_v22  ;;  %v2101_v22 = vld [vmem:[%s3327_s25] ss:$0 sm:$0xff] }
 0x6a2   :  { %v1811_v25 = vmul.f32 %v1807_v24, %v1807_v24 }
 0x6a4   :  { %v1813_v49 = vsel %vm327_vm0, %v1811_v25, 0.0 }
 0x6a5   :  { %1814 = vadd.xlane.f32.xlu2 %v1813_v49 }
 0x6a7   :  { %v1808_v26 = vpop.f32.mrf.mxu3 }
 0x6a8   :  { %v1809_v9 = vadd.f32 %v2099_v20, %v1808_v26 }
 0x6aa   :  { %v1812_v16 = vmul.f32 %v1809_v9, %v1809_v9 }
 0x6ac   :  { %v1816_v34 = vsel %vm327_vm0, %v1812_v16, 0.0 }
 0x6ad   :  { %1817 = vadd.xlane.f32.xlu1 %v1816_v34 }
 0x718   :  { %v1815_v11 = vpop.xlane.xlu2 %1814 }
 0x719   :  { %v1819_v39 = vmul.f32 %v1815_v11, %v2834_v13 }
 0x71b   :  { %v1821_v41 = vadd.f32 1e-05, %v1819_v39 }
 0x71d   :  { %2212 = vrsqrt.f32 %v1821_v41  ;;  %vm1829_vm14 = vweird.f32 %v1821_v41 }
 0x720   :  { %v1818_v36 = vpop.xlane.xlu1 %1817 }
 0x721   :  { %v1820_v8 = vmul.f32 %v1818_v36, %v2834_v13 }
 0x723   :  { %v2213_v46 = vpop.eup %2212  ;;  %v1822_v28 = vadd.f32 1e-05, %v1820_v8 }
 0x724   :  { %v1824_v33 = vmul.f32 %v2213_v46, %v1821_v41  ;;  %vm1830_vm7 = vweird.f32 %v2213_v46 }
 0x725   :  { %2214 = vrsqrt.f32 %v1822_v28  ;;  %vm1831_vm15 = vmor %vm1829_vm14, %vm1830_vm7  ;;  %vm1839_vm2 = vweird.f32 %v1822_v28 }
 0x726   :  { %v1825_v60 = vmul.f32 %v2213_v46, %v1824_v33  ;;  %2216 = vrcp.f32 %v2638_v12 }
 0x728   :  { %v1826_v54 = vmul.f32 0.5, %v1825_v60 }
 0x72a   :  { %v1827_v47 = vsub.f32 1.5, %v1826_v54 }
 0x72b   :  { %v2215_v13 = vpop.eup %2214 }
 0x72c   :  { %v1828_v48 = vmul.f32 %v2213_v46, %v1827_v47  ;;  %v1834_v2 = vmul.f32 %v2215_v13, %v1822_v28  ;;  %v2217_v57 = vpop.eup %2216  ;;  %vm1840_vm1 = vweird.f32 %v2215_v13 }
 0x72d   :  { %v1866_v14 = vmul.f32 8.0, %v2217_v57  ;;  %vm1841_vm8 = vmor %vm1839_vm2, %vm1840_vm1  ;;  %vm1870_vm9 = vweird.f32 %v2217_v57 }
 0x72e   :  { %v1832_v55 = vsel %vm1831_vm15, %v2213_v46, %v1828_v48  ;;  %v1835_v52 = vmul.f32 %v2215_v13, %v1834_v2 }
 0x72f   :  { %v1843_v44 = vmul.f32 %v1832_v55, %v1807_v24  ;;  %v1867_v29 = vsub.f32 1.0, %v1866_v14 }
 0x730   :  { %v1836_v42 = vmul.f32 0.5, %v1835_v52 }
 0x731   :  { %v1849_v58 = vmul.f32 %v2100_v35, %v1843_v44  ;;  %v1868_v56 = vmul.f32 %v2217_v57, %v1867_v29 }
 0x732   :  { %v1837_v61 = vsub.f32 1.5, %v1836_v42 }
 0x733   :  { %v1851_v37 = vsel %vm327_vm0, %v1849_v58, 0.0  ;;  %v1869_v5 = vadd.f32 %v2217_v57, %v1868_v56 }
 0x734   :  { %v1852_v63 = vrot.slane %v1851_v37, 4  ;;  %v1838_v59 = vmul.f32 %v2215_v13, %v1837_v61 }
 0x735   :  { %v1871_v3 = vsel %vm1870_vm9, %v2217_v57, %v1869_v5 }
 0x736   :  { %v1853_v17 = vadd.f32 %v1852_v63, %v1851_v37  ;;  %v1842_v6 = vsel %vm1841_vm8, %v2215_v13, %v1838_v59 }
 0x737   :  { %v1844_v53 = vmul.f32 %v1842_v6, %v1809_v9 }
 0x738   :  { %v1854_v62 = vrot.slane %v1853_v17, 2 }
 0x739   :  { %v1850_v10 = vmul.f32 %v2100_v35, %v1844_v53 }
 0x73a   :  { %v1855_v0 = vadd.f32 %v1854_v62, %v1853_v17 }
 0x73b   :  { %v1858_v1 = vsel %vm327_vm0, %v1850_v10, 0.0 }
 0x73c   :  { %v1859_v27 = vrot.slane %v1858_v1, 4  ;;  %v1856_v21 = vrot.slane %v1855_v0, 1 }
 0x73e   :  { %v1860_v30 = vadd.f32 %v1859_v27, %v1858_v1  ;;  %v1857_v7 = vadd.f32 %v1856_v21, %v1855_v0 }
 0x740   :  { %v1861_v38 = vrot.slane %v1860_v30, 2  ;;  %v1872_v18 = vmul.f32 %v1871_v3, %v1857_v7 }
 0x742   :  { %v1862_v4 = vadd.f32 %v1861_v38, %v1860_v30  ;;  %v1874_v32 = vpack.c.bf16 %v1872_v18, %v1872_v18 }
 0x744   :  { %v1863_v15 = vrot.slane %v1862_v4, 1  ;;  %v1886_v51 = vunpack.c.l.b16 %v1874_v32 }
 0x746   :  { %v1864_v19 = vadd.f32 %v1863_v15, %v1862_v4 }
 0x748   :  { %v1873_v50 = vmul.f32 %v1871_v3, %v1864_v19 }
 0x74a   :  { %v1875_v43 = vpack.c.bf16 %v1873_v50, %v1873_v50 }
 0x74c   :  { %v1887_v40 = vunpack.c.l.b16 %v1875_v43 }
 0x74e   :  { %v1889_v23 = vsel %vm1888_vm10, %v1887_v40, %v1886_v51 }
 0x74f   :  { %v1890_v20 = vpack.c.b16 %v1889_v23, %v1889_v23 }
 0x751   :  { %2042 = vmatmul.msk.bf16.vlgmr.msrb.gmra.mxu1 %vm327_vm0, %v1890_v20 }
 0x7ce   :  { %v1915_v24 = vpop.f32.mrf.mxu1 }
 0x7cf   :  { %v1916_v25 = vadd.f32 %v2101_v22, %v1915_v24 }
 0x7d1   :  { %1919 = vst [vmem:[#allocation26] sm:$0x3] %v1916_v25 }
 0x7d2   :  { %1930 = dma.vmem_to_hbm [thread:$0]  %s1926_s19, 32, %s1928_s5, [#allocation4]  }
 0x7d6   :  { %v1917_v49 = vpop.f32.mrf.mxu1 }
 0x7d7   :  { %2618 = dma.done.wait [#allocation4], 32  }
 0x7d8   :  { %2619 = vsyncadd [#allocation4], 4294967264 }
 0x7d9   :  { %1935 = vsyncpa [#allocation3], 1 }
 0x7da   :  { %1936 = vsyncpa [#allocation6], 1 }
 0x7db   :  { %1937 = vsyncpa [#allocation9], 1 }
 0x7dc   :  { %1938 = vsyncpa [#allocation12], 1 }
 0x7dd   :  { %1939 = vsyncpa [#allocation15], 1 }
 0x7de   :  { %1940 = vsyncpa [#allocation18], 1 }
 0x7df   :  { %1941 = vsyncpa [#allocation21], 1 }
 0x7e0   :  { %1942 = vsyncpa [#allocation24], 1 }
 0x7e1   :  { %1943 = vsyncpa [#allocation4], 1 }

</bundles_post_ra>
